<compile_context>
chip_gen: v6e
topology: v6e:2x2x1
jax: 0.10.0
libtpu: 0.0.40
codegen_flags: <defaults>
</compile_context>

<pallas_src>
import functools

import jax
import jax.numpy as jnp
from jax.experimental import pallas as pl
from jax.experimental.pallas import tpu as pltpu


_LABEL_PAD = 128  # lane-friendly width for the final conv head (sliced later)


# ----------------------------------------------------------------------------
# Device profile (generation-aware block sizes / VMEM limits)
# ----------------------------------------------------------------------------
def _device_profile():
    kind = ""
    try:
        kind = jax.devices()[0].device_kind.lower()
    except Exception:
        pass
    if ("v5e" in kind) or ("v5 lite" in kind) or ("v5lite" in kind):
        # 128-deep MXU, 128 MiB VMEM, single TC
        return dict(cin_max=128, cout_max=512,
                    vmem_limit=96 * 1024 * 1024, vmem_budget=64 * 1024 * 1024,
                    multicore=False)
    if "v7" in kind or "7x" in kind:
        # 64 MiB VMEM, 2 TensorCores per chip
        return dict(cin_max=256, cout_max=512,
                    vmem_limit=48 * 1024 * 1024, vmem_budget=36 * 1024 * 1024,
                    multicore=True)
    # v6e / other (128 MiB VMEM class)
    return dict(cin_max=256, cout_max=512,
                vmem_limit=96 * 1024 * 1024, vmem_budget=64 * 1024 * 1024,
                multicore=False)


def _dim_semantics(prof):
    if prof.get("multicore"):
        core_par = getattr(pltpu, "CORE_PARALLEL", "parallel")
        return (core_par, "parallel", "arbitrary", "arbitrary")
    return ("parallel", "parallel", "arbitrary", "arbitrary")


def _choose_tiling(H, W, Cin, Cout, cin_b, prof, max_h_block=None):
    """Pick (h_blk, cout_b) so the per-step VMEM footprint fits the budget."""
    budget = prof["vmem_budget"]
    cout_b = min(Cout, prof["cout_max"])
    use_im2col = (cin_b % 64 == 0) and (cin_b <= 128)
    multi_ci = Cin > cin_b

    divisors = [d for d in range(H, 0, -1) if H % d == 0]
    if max_h_block is not None:
        capped = [d for d in divisors if d <= max_h_block]
        divisors = capped if capped else [divisors[-1]]

    def footprint(h, cob):
        f = H * W * cin_b * 2 * 2                    # activation block (x2 buf)
        f += 9 * cin_b * cob * 2 * 2                 # weight block (x2 buf)
        f += (h + 2) * (W + 2) * cin_b * 2           # halo scratch
        f += h * W * cob * 2 * 2                     # output block (x2 buf)
        if use_im2col:
            f += h * W * 9 * cin_b * 2               # tap-concat (im2col) scratch
        if multi_ci:
            f += h * W * cob * 4                     # f32 accumulator
        return f

    while True:
        for h in divisors:
            if footprint(h, cout_b) <= budget:
                return h, cout_b, use_im2col, multi_ci
        if cout_b > 128 and Cout % (cout_b // 2) == 0:
            cout_b //= 2
        else:
            return divisors[-1], cout_b, use_im2col, multi_ci


# ----------------------------------------------------------------------------
# Pallas kernel: fused 3x3 conv (pad=1) + folded BN (scale/shift) + optional ReLU
# ----------------------------------------------------------------------------
def _conv3x3_bn_relu_kernel(x_ref, w_ref, scale_ref, shift_ref, out_ref, *scratch,
                            h_blk, W, relu, use_im2col, multi_ci):
    # x_ref:     (1, H, W, cin_b)          bf16 activation block (full H)
    # w_ref:     (1, 9*cin_b, cout_b)      bf16 packed (tap-major) weight block
    # scale_ref: (1, cout_b)               f32 folded BN scale
    # shift_ref: (1, cout_b)               f32 folded BN shift (incl. conv bias)
    # out_ref:   (1, h_blk, W, cout_b)     one row block of the output
    idx = 0
    xp_ref = scratch[idx]; idx += 1
    col_ref = None
    if use_im2col:
        col_ref = scratch[idx]; idx += 1
    acc_ref = scratch[idx] if multi_ci else None

    rb = pl.program_id(2)
    ci = pl.program_id(3)
    n_rows = pl.num_programs(2)
    last_ci = pl.num_programs(3) - 1
    cin_b = x_ref.shape[3]
    cout_b = out_ref.shape[3]

    r0 = rb * h_blk
    if h_blk % 8 == 0:
        r0 = pl.multiple_of(r0, 8)

    # ---- halo'd row window in VMEM: zero only the 1-px border strips ----
    zcol = jnp.zeros((h_blk + 2, 1, cin_b), xp_ref.dtype)
    xp_ref[:, 0:1, :] = zcol
    xp_ref[:, W + 1:W + 2, :] = zcol
    xp_ref[1:h_blk + 1, 1:W + 1, :] = x_ref[0, pl.ds(r0, h_blk), :, :]

    zrow = jnp.zeros((1, W, cin_b), xp_ref.dtype)

    @pl.when(rb == 0)
    def _():
        xp_ref[0:1, 1:W + 1, :] = zrow

    @pl.when(rb > 0)
    def _():
        xp_ref[0:1, 1:W + 1, :] = x_ref[0, pl.ds(r0 - 1, 1), :, :]

    @pl.when(rb == n_rows - 1)
    def _():
        xp_ref[h_blk + 1:h_blk + 2, 1:W + 1, :] = zrow

    @pl.when(rb < n_rows - 1)
    def _():
        xp_ref[h_blk + 1:h_blk + 2, 1:W + 1, :] = x_ref[0, pl.ds(r0 + h_blk, 1), :, :]

    # ---- matmul(s) on the MXU, f32 accumulation ----
    if use_im2col:
        # Tap-concatenated K: one matmul with K = 9*cin_b fills the MXU for the
        # cin=64/128 layers; tap accumulation happens inside the MXU.
        for dw in range(3):
            xw = xp_ref[:, dw:dw + W, :]              # one relayout per dw, reused 3x
            for dh in range(3):
                t = 3 * dh + dw
                col_ref[:, t * cin_b:(t + 1) * cin_b] = (
                    xw[dh:dh + h_blk].reshape(h_blk * W, cin_b))
        acc = jnp.dot(col_ref[...], w_ref[0],
                      preferred_element_type=jnp.float32)
    else:
        # cin_b >= 256 (or tiny first layer): K already fills the MXU, so avoid
        # the 9x im2col buffer/copy traffic and accumulate 9 matmuls.
        acc = None
        for dw in range(3):
            xw = xp_ref[:, dw:dw + W, :]
            for dh in range(3):
                t = 3 * dh + dw
                patch = xw[dh:dh + h_blk].reshape(h_blk * W, cin_b)
                part = jnp.dot(patch, w_ref[0, t * cin_b:(t + 1) * cin_b, :],
                               preferred_element_type=jnp.float32)
                acc = part if acc is None else acc + part

    def epilogue(total):
        y = total * scale_ref[0] + shift_ref[0]       # f32 epilogue
        if relu:
            y = jnp.maximum(y, 0.0)
        out_ref[...] = y.reshape(1, h_blk, W, cout_b).astype(out_ref.dtype)

    if not multi_ci:
        # Single Cin block: no accumulator scratch / round trips at all.
        epilogue(acc)
    else:
        @pl.when(ci == 0)
        def _():
            acc_ref[...] = acc

        @pl.when(jnp.logical_and(ci > 0, ci < last_ci))
        def _():
            acc_ref[...] += acc

        @pl.when(ci == last_ci)
        def _():
            epilogue(acc_ref[...] + acc)              # fold last partial into epilogue


def conv3x3_bn_relu(x_nhwc, w_packed, scale, shift, *, relu=True,
                    out_dtype=jnp.bfloat16, prof=None, max_h_block=None):
    if prof is None:
        prof = _device_profile()
    N, H, W, Cin = x_nhwc.shape
    n_ci, k9, Cout = w_packed.shape
    cin_b = k9 // 9
    assert n_ci * cin_b == Cin, (n_ci, cin_b, Cin)

    h_blk, cout_b, use_im2col, multi_ci = _choose_tiling(
        H, W, Cin, Cout, cin_b, prof, max_h_block)
    n_rows = H // h_blk
    n_co = Cout // cout_b

    scratch = [pltpu.VMEM((h_blk + 2, W + 2, cin_b), jnp.bfloat16)]   # halo window
    if use_im2col:
        scratch.append(pltpu.VMEM((h_blk * W, 9 * cin_b), jnp.bfloat16))
    if multi_ci:
        scratch.append(pltpu.VMEM((h_blk * W, cout_b), jnp.float32))

    kernel = functools.partial(_conv3x3_bn_relu_kernel, h_blk=h_blk, W=W,
                               relu=relu, use_im2col=use_im2col,
                               multi_ci=multi_ci)

    return pl.pallas_call(
        kernel,
        out_shape=jax.ShapeDtypeStruct((N, H, W, Cout), out_dtype),
        grid_spec=pltpu.PrefetchScalarGridSpec(
            num_scalar_prefetch=0,
            grid=(N, n_co, n_rows, n_ci),              # Cin reduction axis last
            in_specs=[
                pl.BlockSpec((1, H, W, cin_b),
                             lambda n, co, rb, ci: (n, 0, 0, ci)),
                pl.BlockSpec((1, 9 * cin_b, cout_b),
                             lambda n, co, rb, ci: (ci, 0, co)),
                pl.BlockSpec((1, cout_b), lambda n, co, rb, ci: (0, co)),
                pl.BlockSpec((1, cout_b), lambda n, co, rb, ci: (0, co)),
            ],
            out_specs=pl.BlockSpec((1, h_blk, W, cout_b),
                                   lambda n, co, rb, ci: (n, rb, 0, co)),
            scratch_shapes=scratch),
        compiler_params=pltpu.CompilerParams(
            dimension_semantics=_dim_semantics(prof),
            vmem_limit_bytes=prof["vmem_limit"]),
    )(x_nhwc.astype(jnp.bfloat16), w_packed.astype(jnp.bfloat16),
      scale.astype(jnp.float32), shift.astype(jnp.float32))


# ----------------------------------------------------------------------------
# Max pool / unpool with indices (plain JAX glue; C stays on the lane dim)
# ----------------------------------------------------------------------------
def max_pool2x2(x):
    # x: (N, H, W, C) -> pooled (N, H/2, W/2, C), idx in {0,1,2,3} (= 2*dh+dw)
    a = x[:, 0::2, 0::2, :]
    b = x[:, 0::2, 1::2, :]
    c = x[:, 1::2, 0::2, :]
    d = x[:, 1::2, 1::2, :]
    m_ab = jnp.maximum(a, b)
    i_ab = jnp.where(a >= b, 0, 1).astype(jnp.int32)
    m_cd = jnp.maximum(c, d)
    i_cd = jnp.where(c >= d, 2, 3).astype(jnp.int32)
    pooled = jnp.maximum(m_ab, m_cd)
    idx = jnp.where(m_ab >= m_cd, i_ab, i_cd)
    return pooled, idx


def max_unpool2x2(x, idx):
    # x, idx: (N, Hp, Wp, C) -> (N, 2*Hp, 2*Wp, C); value placed at idx, 0 elsewhere
    N, Hp, Wp, C = x.shape
    zero = jnp.zeros_like(x)
    t00 = jnp.where(idx == 0, x, zero)
    t01 = jnp.where(idx == 1, x, zero)
    t10 = jnp.where(idx == 2, x, zero)
    t11 = jnp.where(idx == 3, x, zero)
    top = jnp.stack([t00, t01], axis=3).reshape(N, Hp, 2 * Wp, C)   # interleave W
    bot = jnp.stack([t10, t11], axis=3).reshape(N, Hp, 2 * Wp, C)
    return jnp.stack([top, bot], axis=2).reshape(N, 2 * Hp, 2 * Wp, C)  # interleave H


# ----------------------------------------------------------------------------
# Parameter construction (conv weight/bias + folded BN), host-side weight packing
# ----------------------------------------------------------------------------
def pack_conv_weight(w_hwio, cin_b):
    # (3, 3, Cin, Cout) -> (n_ci, 9*cin_b, Cout): per Cin-block, tap-major rows.
    _, _, cin, cout = w_hwio.shape
    assert cin % cin_b == 0
    n_ci = cin // cin_b
    w = w_hwio.reshape(9, n_ci, cin_b, cout).transpose(1, 0, 2, 3)
    return w.reshape(n_ci, 9 * cin_b, cout)


def init_conv_bn(key, cin, cout, cin_b, with_bn=True, cout_pad=None):
    k1, k2, k3, k4, k5, k6 = jax.random.split(key, 6)
    w = jax.random.normal(k1, (3, 3, cin, cout), jnp.float32) * (0.3 / (cin ** 0.5))
    b = 0.1 * jax.random.normal(k2, (cout,), jnp.float32)
    if with_bn:
        gamma = 1.0 + 0.1 * jax.random.normal(k3, (cout,), jnp.float32)
        beta = 0.1 * jax.random.normal(k4, (cout,), jnp.float32)
        mean = 0.1 * jax.random.normal(k5, (cout,), jnp.float32)
        var = jax.random.uniform(k6, (cout,), jnp.float32, minval=0.5, maxval=1.5)
        scale = gamma / jnp.sqrt(var + 1e-5)
        shift = (b - mean) * scale + beta
    else:
        scale = jnp.ones((cout,), jnp.float32)
        shift = b
    if cout_pad is not None and cout_pad > cout:
        pad = cout_pad - cout
        w = jnp.pad(w, ((0, 0), (0, 0), (0, 0), (0, pad)))
        scale = jnp.pad(scale, (0, pad), constant_values=1.0)
        shift = jnp.pad(shift, (0, pad))
        cout = cout_pad
    return dict(w=pack_conv_weight(w, cin_b).astype(jnp.bfloat16),
                scale=scale.reshape(1, cout).astype(jnp.float32),
                shift=shift.reshape(1, cout).astype(jnp.float32))


_LAYERS = [
    # encoder
    ("conv11", 0, 64), ("conv12", 64, 64),
    ("conv21", 64, 128), ("conv22", 128, 128),
    ("conv31", 128, 256), ("conv32", 256, 256), ("conv33", 256, 256),
    ("conv41", 256, 512), ("conv42", 512, 512), ("conv43", 512, 512),
    ("conv51", 512, 512), ("conv52", 512, 512), ("conv53", 512, 512),
    # decoder
    ("conv53d", 512, 512), ("conv52d", 512, 512), ("conv51d", 512, 512),
    ("conv43d", 512, 512), ("conv42d", 512, 512), ("conv41d", 512, 256),
    ("conv33d", 256, 256), ("conv32d", 256, 256), ("conv31d", 256, 128),
    ("conv22d", 128, 128), ("conv21d", 128, 64),
    ("conv12d", 64, 64), ("conv11d", 64, 0),
]


def init_segnet_params(key, input_nbr, label_nbr, prof=None):
    if prof is None:
        prof = _device_profile()
    params = {}
    keys = jax.random.split(key, len(_LAYERS))
    for k, (name, cin, cout) in zip(keys, _LAYERS):
        cin = input_nbr if name == "conv11" else cin
        cin_b = min(cin, prof["cin_max"])
        if name == "conv11d":
            # lane-pad the tiny label head; output is sliced in the wrapper
            params[name] = init_conv_bn(k, cin, label_nbr, cin_b, with_bn=False,
                                        cout_pad=_LABEL_PAD)
        else:
            params[name] = init_conv_bn(k, cin, cout, cin_b, with_bn=True)
    return params


# ----------------------------------------------------------------------------
# SegNet forward (mirrors the PyTorch forward exactly)
# ----------------------------------------------------------------------------
def segnet_forward(params, x_nchw, *, label_nbr):
    prof = _device_profile()
    x = jnp.transpose(x_nchw, (0, 2, 3, 1)).astype(jnp.bfloat16)   # -> NHWC
    _, H, W, _ = x.shape
    if H % 32 or W % 32:
        raise ValueError("spatial dims must be divisible by 32 (5 pooling levels)")

    def c(name, t, relu=True, out_dtype=jnp.bfloat16):
        p = params[name]
        return conv3x3_bn_relu(t, p["w"], p["scale"], p["shift"],
                               relu=relu, out_dtype=out_dtype, prof=prof)

    x11 = c("conv11", x)
    x12 = c("conv12", x11)
    x1p, id1 = max_pool2x2(x12)

    x21 = c("conv21", x1p)
    x22 = c("conv22", x21)
    x2p, id2 = max_pool2x2(x22)

    x31 = c("conv31", x2p)
    x32 = c("conv32", x31)
    x33 = c("conv33", x32)
    x3p, id3 = max_pool2x2(x33)

    x41 = c("conv41", x3p)
    x42 = c("conv42", x41)
    x43 = c("conv43", x42)
    x4p, id4 = max_pool2x2(x43)

    x51 = c("conv51", x4p)
    x52 = c("conv52", x51)
    x53 = c("conv53", x52)
    x5p, id5 = max_pool2x2(x53)

    x5d = max_unpool2x2(x5p, id5)
    x53d = c("conv53d", x5d)
    x52d = c("conv52d", x53d)
    x51d = c("conv51d", x52d)

    x4d = max_unpool2x2(x51d, id4)
    x43d = c("conv43d", x4d)
    x42d = c("conv42d", x43d)
    x41d = c("conv41d", x42d)

    x3d = max_unpool2x2(x41d, id3)
    x33d = c("conv33d", x3d)
    x32d = c("conv32d", x33d)
    x31d = c("conv31d", x32d)

    x2d = max_unpool2x2(x31d, id2)
    x22d = c("conv22d", x2d)
    x21d = c("conv21d", x22d)

    x1d = max_unpool2x2(x21d, id1)
    x12d = c("conv12d", x1d)
    x11d = c("conv11d", x12d, relu=False, out_dtype=jnp.float32)
    x11d = x11d[..., :label_nbr]                                   # drop lane pad

    return jnp.transpose(x11d, (0, 3, 1, 2))                       # -> NCHW


# ----------------------------------------------------------------------------
# Self-test + demo
# ----------------------------------------------------------------------------
if __name__ == "__main__":
    input_nbr, label_nbr = 4, 3
    N, H, W = 2, 32, 32          # 32 spatial -> survives 5 levels of 2x2 pooling

    prof = _device_profile()

    # -- correctness checks of the fused conv kernel vs a plain-JAX reference --
    def ref_conv(x, w_hwio, scale, shift, relu):
        y = jax.lax.conv_general_dilated(
            x.astype(jnp.bfloat16), w_hwio.astype(jnp.bfloat16),
            window_strides=(1, 1), padding="SAME",
            dimension_numbers=("NHWC", "HWIO", "NHWC"),
            preferred_element_type=jnp.float32)
        y = y * scale.reshape(1, 1, 1, -1) + shift.reshape(1, 1, 1, -1)
        if relu:
            y = jnp.maximum(y, 0.0)
        return y.astype(jnp.bfloat16)

    def check(cin, cout, hh, ww, max_h_block=None, seed=1):
        kk = jax.random.PRNGKey(seed)
        kx, kw, ks, kb = jax.random.split(kk, 4)
        xc = jax.random.normal(kx, (1, hh, ww, cin), jnp.float32)
        wc = jax.random.normal(kw, (3, 3, cin, cout), jnp.float32) * (0.3 / cin ** 0.5)
        sc = 1.0 + 0.1 * jax.random.normal(ks, (cout,), jnp.float32)
        sh = 0.1 * jax.random.normal(kb, (cout,), jnp.float32)
        cin_b = min(cin, prof["cin_max"])
        wp = pack_conv_weight(wc, cin_b).astype(jnp.bfloat16)
        got = conv3x3_bn_relu(xc.astype(jnp.bfloat16), wp,
                              sc.reshape(1, -1), sh.reshape(1, -1),
                              relu=True, prof=prof, max_h_block=max_h_block)
        want = ref_conv(xc, wc, sc, sh, True)
        ok = jnp.allclose(got.astype(jnp.float32), want.astype(jnp.float32),
                          rtol=0.05, atol=0.05)
        assert bool(ok), f"conv check failed (cin={cin}, cout={cout})"

    check(64, 128, 16, 16, max_h_block=4)   # im2col path + interior row-block halos
    check(512, 256, 8, 8)                   # multi-Cin-block accumulation path

    # -- full SegNet forward --
    key = jax.random.PRNGKey(0)
    k_params, k_x = jax.random.split(key)
    params = init_segnet_params(k_params, input_nbr, label_nbr, prof)
    x = jax.random.normal(k_x, (N, input_nbr, H, W), jnp.float32)   # NCHW input

    fwd = jax.jit(functools.partial(segnet_forward, label_nbr=label_nbr))
    out = jax.block_until_ready(fwd(params, x))

    assert out.shape == (N, label_nbr, H, W), out.shape
    assert bool(jnp.all(jnp.isfinite(out)))
    print("KERNEL_OK")
</pallas_src>

<mosaic_0001>
module attributes {stable_mosaic.version = 11 : i64} {
  func.func @_conv3x3_bn_relu_kernel(%arg0: i32, %arg1: i32, %arg2: i32, %arg3: i32, %arg4: memref<1x16x16x64xbf16, #tpu.memory_space<vmem>>, %arg5: memref<1x576x128xbf16, #tpu.memory_space<vmem>>, %arg6: memref<1x128xf32, #tpu.memory_space<vmem>>, %arg7: memref<1x128xf32, #tpu.memory_space<vmem>>, %arg8: memref<1x4x16x128xbf16, #tpu.memory_space<vmem>>, %arg9: memref<6x18x64xbf16, #tpu.memory_space<vmem>>, %arg10: memref<64x576xbf16, #tpu.memory_space<vmem>>) attributes {dimension_semantics = [#tpu.dimension_semantics<parallel>, #tpu.dimension_semantics<parallel>, #tpu.dimension_semantics<arbitrary>, #tpu.dimension_semantics<arbitrary>], iteration_bounds = array<i64: 1, 1, 4, 1>, scalar_prefetch = 0 : i64, scratch_operands = 2 : i64, tpu.core_type = #tpu.core_type<tc>, window_params = [{transform_indices = @transform_0, window_bounds = array<i64: 1, 16, 16, 64>}, {transform_indices = @transform_1, window_bounds = array<i64: 1, 576, 128>}, {transform_indices = @transform_2, window_bounds = array<i64: 1, 128>}, {transform_indices = @transform_3, window_bounds = array<i64: 1, 128>}, {transform_indices = @transform_4, window_bounds = array<i64: 1, 4, 16, 128>}]} {
    %c4_i32 = arith.constant 4 : i32
    %0 = arith.muli %arg2, %c4_i32 : i32
    %cst = arith.constant 0.000000e+00 : bf16
    %1 = vector.broadcast %cst : bf16 to vector<6x1x64xbf16>
    %c0 = arith.constant 0 : index
    %c0_0 = arith.constant 0 : index
    %c0_1 = arith.constant 0 : index
    %2 = vector.load %arg9[%c0, %c0_0, %c0_1] : memref<6x18x64xbf16, #tpu.memory_space<vmem>>, vector<6x1x64xbf16>
    tpu.vector_store %arg9[%c0, %c0_0, %c0_1], %1 {strides = array<i32>} : memref<6x18x64xbf16, #tpu.memory_space<vmem>>, vector<6x1x64xbf16>,
    %c0_2 = arith.constant 0 : index
    %c17 = arith.constant 17 : index
    %c0_3 = arith.constant 0 : index
    %3 = vector.load %arg9[%c0_2, %c17, %c0_3] : memref<6x18x64xbf16, #tpu.memory_space<vmem>>, vector<6x1x64xbf16>
    tpu.vector_store %arg9[%c0_2, %c17, %c0_3], %1 {strides = array<i32>} : memref<6x18x64xbf16, #tpu.memory_space<vmem>>, vector<6x1x64xbf16>,
    %c0_4 = arith.constant 0 : index
    %4 = arith.index_cast %0 : i32 to index
    %c0_5 = arith.constant 0 : index
    %c0_6 = arith.constant 0 : index
    %5 = vector.load %arg4[%c0_4, %4, %c0_5, %c0_6] : memref<1x16x16x64xbf16, #tpu.memory_space<vmem>>, vector<1x4x16x64xbf16>
    %6 = vector.shape_cast %5 : vector<1x4x16x64xbf16> to vector<4x16x64xbf16>
    %c1 = arith.constant 1 : index
    %c1_7 = arith.constant 1 : index
    %c0_8 = arith.constant 0 : index
    %7 = vector.load %arg9[%c1, %c1_7, %c0_8] : memref<6x18x64xbf16, #tpu.memory_space<vmem>>, vector<4x16x64xbf16>
    tpu.vector_store %arg9[%c1, %c1_7, %c0_8], %6 {strides = array<i32>} : memref<6x18x64xbf16, #tpu.memory_space<vmem>>, vector<4x16x64xbf16>,
    %cst_9 = arith.constant 0.000000e+00 : bf16
    %8 = vector.broadcast %cst_9 : bf16 to vector<1x16x64xbf16>
    %c0_i32 = arith.constant 0 : i32
    %9 = arith.cmpi eq, %arg2, %c0_i32 : i32
    %10 = arith.extui %9 : i1 to i32
    %c0_i32_10 = arith.constant 0 : i32
    %11 = arith.cmpi ne, %10, %c0_i32_10 : i32
    scf.if %11 {
      %c0_49 = arith.constant 0 : index
      %c1_50 = arith.constant 1 : index
      %c0_51 = arith.constant 0 : index
      %70 = vector.load %arg9[%c0_49, %c1_50, %c0_51] : memref<6x18x64xbf16, #tpu.memory_space<vmem>>, vector<1x16x64xbf16>
      tpu.vector_store %arg9[%c0_49, %c1_50, %c0_51], %8 {strides = array<i32>} : memref<6x18x64xbf16, #tpu.memory_space<vmem>>, vector<1x16x64xbf16>,
    } else {
    }
    %c0_i32_11 = arith.constant 0 : i32
    %12 = arith.cmpi sgt, %arg2, %c0_i32_11 : i32
    %13 = arith.extui %12 : i1 to i32
    %c0_i32_12 = arith.constant 0 : i32
    %14 = arith.cmpi ne, %13, %c0_i32_12 : i32
    scf.if %14 {
      %c1_i32 = arith.constant 1 : i32
      %70 = arith.subi %0, %c1_i32 : i32
      %c0_49 = arith.constant 0 : index
      %71 = arith.index_cast %70 : i32 to index
      %c0_50 = arith.constant 0 : index
      %c0_51 = arith.constant 0 : index
      %72 = vector.load %arg4[%c0_49, %71, %c0_50, %c0_51] : memref<1x16x16x64xbf16, #tpu.memory_space<vmem>>, vector<1x1x16x64xbf16>
      %73 = vector.shape_cast %72 : vector<1x1x16x64xbf16> to vector<1x16x64xbf16>
      %c0_52 = arith.constant 0 : index
      %c1_53 = arith.constant 1 : index
      %c0_54 = arith.constant 0 : index
      %74 = vector.load %arg9[%c0_52, %c1_53, %c0_54] : memref<6x18x64xbf16, #tpu.memory_space<vmem>>, vector<1x16x64xbf16>
      tpu.vector_store %arg9[%c0_52, %c1_53, %c0_54], %73 {strides = array<i32>} : memref<6x18x64xbf16, #tpu.memory_space<vmem>>, vector<1x16x64xbf16>,
    } else {
    }
    %c3_i32 = arith.constant 3 : i32
    %15 = arith.cmpi eq, %arg2, %c3_i32 : i32
    %16 = arith.extui %15 : i1 to i32
    %c0_i32_13 = arith.constant 0 : i32
    %17 = arith.cmpi ne, %16, %c0_i32_13 : i32
    scf.if %17 {
      %c5 = arith.constant 5 : index
      %c1_49 = arith.constant 1 : index
      %c0_50 = arith.constant 0 : index
      %70 = vector.load %arg9[%c5, %c1_49, %c0_50] : memref<6x18x64xbf16, #tpu.memory_space<vmem>>, vector<1x16x64xbf16>
      tpu.vector_store %arg9[%c5, %c1_49, %c0_50], %8 {strides = array<i32>} : memref<6x18x64xbf16, #tpu.memory_space<vmem>>, vector<1x16x64xbf16>,
    } else {
    }
    %c3_i32_14 = arith.constant 3 : i32
    %18 = arith.cmpi slt, %arg2, %c3_i32_14 : i32
    %19 = arith.extui %18 : i1 to i32
    %c0_i32_15 = arith.constant 0 : i32
    %20 = arith.cmpi ne, %19, %c0_i32_15 : i32
    scf.if %20 {
      %c4_i32_49 = arith.constant 4 : i32
      %70 = arith.addi %0, %c4_i32_49 : i32
      %c0_50 = arith.constant 0 : index
      %71 = arith.index_cast %70 : i32 to index
      %c0_51 = arith.constant 0 : index
      %c0_52 = arith.constant 0 : index
      %72 = vector.load %arg4[%c0_50, %71, %c0_51, %c0_52] : memref<1x16x16x64xbf16, #tpu.memory_space<vmem>>, vector<1x1x16x64xbf16>
      %73 = vector.shape_cast %72 : vector<1x1x16x64xbf16> to vector<1x16x64xbf16>
      %c5 = arith.constant 5 : index
      %c1_53 = arith.constant 1 : index
      %c0_54 = arith.constant 0 : index
      %74 = vector.load %arg9[%c5, %c1_53, %c0_54] : memref<6x18x64xbf16, #tpu.memory_space<vmem>>, vector<1x16x64xbf16>
      tpu.vector_store %arg9[%c5, %c1_53, %c0_54], %73 {strides = array<i32>} : memref<6x18x64xbf16, #tpu.memory_space<vmem>>, vector<1x16x64xbf16>,
    } else {
    }
    %c0_16 = arith.constant 0 : index
    %c0_17 = arith.constant 0 : index
    %c0_18 = arith.constant 0 : index
    %21 = vector.load %arg9[%c0_16, %c0_17, %c0_18] : memref<6x18x64xbf16, #tpu.memory_space<vmem>>, vector<6x16x64xbf16>
    %22 = vector.extract_strided_slice %21 {offsets = [0, 0, 0], sizes = [4, 16, 64], strides = [1, 1, 1]} : vector<6x16x64xbf16> to vector<4x16x64xbf16>
    %23 = vector.shape_cast %22 : vector<4x16x64xbf16> to vector<64x64xbf16>
    %c0_19 = arith.constant 0 : index
    %c0_20 = arith.constant 0 : index
    %24 = vector.load %arg10[%c0_19, %c0_20] : memref<64x576xbf16, #tpu.memory_space<vmem>>, vector<64x64xbf16>
    tpu.vector_store %arg10[%c0_19, %c0_20], %23 {strides = array<i32>} : memref<64x576xbf16, #tpu.memory_space<vmem>>, vector<64x64xbf16>,
    %25 = vector.extract_strided_slice %21 {offsets = [1, 0, 0], sizes = [4, 16, 64], strides = [1, 1, 1]} : vector<6x16x64xbf16> to vector<4x16x64xbf16>
    %26 = vector.shape_cast %25 : vector<4x16x64xbf16> to vector<64x64xbf16>
    %c0_21 = arith.constant 0 : index
    %c192 = arith.constant 192 : index
    %27 = vector.load %arg10[%c0_21, %c192] : memref<64x576xbf16, #tpu.memory_space<vmem>>, vector<64x64xbf16>
    tpu.vector_store %arg10[%c0_21, %c192], %26 {strides = array<i32>} : memref<64x576xbf16, #tpu.memory_space<vmem>>, vector<64x64xbf16>,
    %28 = vector.extract_strided_slice %21 {offsets = [2, 0, 0], sizes = [4, 16, 64], strides = [1, 1, 1]} : vector<6x16x64xbf16> to vector<4x16x64xbf16>
    %29 = vector.shape_cast %28 : vector<4x16x64xbf16> to vector<64x64xbf16>
    %c0_22 = arith.constant 0 : index
    %c384 = arith.constant 384 : index
    %30 = vector.load %arg10[%c0_22, %c384] : memref<64x576xbf16, #tpu.memory_space<vmem>>, vector<64x64xbf16>
    tpu.vector_store %arg10[%c0_22, %c384], %29 {strides = array<i32>} : memref<64x576xbf16, #tpu.memory_space<vmem>>, vector<64x64xbf16>,
    %c0_23 = arith.constant 0 : index
    %c1_24 = arith.constant 1 : index
    %c0_25 = arith.constant 0 : index
    %31 = vector.load %arg9[%c0_23, %c1_24, %c0_25] : memref<6x18x64xbf16, #tpu.memory_space<vmem>>, vector<6x16x64xbf16>
    %32 = vector.extract_strided_slice %31 {offsets = [0, 0, 0], sizes = [4, 16, 64], strides = [1, 1, 1]} : vector<6x16x64xbf16> to vector<4x16x64xbf16>
    %33 = vector.shape_cast %32 : vector<4x16x64xbf16> to vector<64x64xbf16>
    %c0_26 = arith.constant 0 : index
    %c64 = arith.constant 64 : index
    %34 = vector.load %arg10[%c0_26, %c64] : memref<64x576xbf16, #tpu.memory_space<vmem>>, vector<64x64xbf16>
    tpu.vector_store %arg10[%c0_26, %c64], %33 {strides = array<i32>} : memref<64x576xbf16, #tpu.memory_space<vmem>>, vector<64x64xbf16>,
    %35 = vector.extract_strided_slice %31 {offsets = [1, 0, 0], sizes = [4, 16, 64], strides = [1, 1, 1]} : vector<6x16x64xbf16> to vector<4x16x64xbf16>
    %36 = vector.shape_cast %35 : vector<4x16x64xbf16> to vector<64x64xbf16>
    %c0_27 = arith.constant 0 : index
    %c256 = arith.constant 256 : index
    %37 = vector.load %arg10[%c0_27, %c256] : memref<64x576xbf16, #tpu.memory_space<vmem>>, vector<64x64xbf16>
    tpu.vector_store %arg10[%c0_27, %c256], %36 {strides = array<i32>} : memref<64x576xbf16, #tpu.memory_space<vmem>>, vector<64x64xbf16>,
    %38 = vector.extract_strided_slice %31 {offsets = [2, 0, 0], sizes = [4, 16, 64], strides = [1, 1, 1]} : vector<6x16x64xbf16> to vector<4x16x64xbf16>
    %39 = vector.shape_cast %38 : vector<4x16x64xbf16> to vector<64x64xbf16>
    %c0_28 = arith.constant 0 : index
    %c448 = arith.constant 448 : index
    %40 = vector.load %arg10[%c0_28, %c448] : memref<64x576xbf16, #tpu.memory_space<vmem>>, vector<64x64xbf16>
    tpu.vector_store %arg10[%c0_28, %c448], %39 {strides = array<i32>} : memref<64x576xbf16, #tpu.memory_space<vmem>>, vector<64x64xbf16>,
    %c0_29 = arith.constant 0 : index
    %c2 = arith.constant 2 : index
    %c0_30 = arith.constant 0 : index
    %41 = vector.load %arg9[%c0_29, %c2, %c0_30] : memref<6x18x64xbf16, #tpu.memory_space<vmem>>, vector<6x16x64xbf16>
    %42 = vector.extract_strided_slice %41 {offsets = [0, 0, 0], sizes = [4, 16, 64], strides = [1, 1, 1]} : vector<6x16x64xbf16> to vector<4x16x64xbf16>
    %43 = vector.shape_cast %42 : vector<4x16x64xbf16> to vector<64x64xbf16>
    %c0_31 = arith.constant 0 : index
    %c128 = arith.constant 128 : index
    %44 = vector.load %arg10[%c0_31, %c128] : memref<64x576xbf16, #tpu.memory_space<vmem>>, vector<64x64xbf16>
    tpu.vector_store %arg10[%c0_31, %c128], %43 {strides = array<i32>} : memref<64x576xbf16, #tpu.memory_space<vmem>>, vector<64x64xbf16>,
    %45 = vector.extract_strided_slice %41 {offsets = [1, 0, 0], sizes = [4, 16, 64], strides = [1, 1, 1]} : vector<6x16x64xbf16> to vector<4x16x64xbf16>
    %46 = vector.shape_cast %45 : vector<4x16x64xbf16> to vector<64x64xbf16>
    %c0_32 = arith.constant 0 : index
    %c320 = arith.constant 320 : index
    %47 = vector.load %arg10[%c0_32, %c320] : memref<64x576xbf16, #tpu.memory_space<vmem>>, vector<64x64xbf16>
    tpu.vector_store %arg10[%c0_32, %c320], %46 {strides = array<i32>} : memref<64x576xbf16, #tpu.memory_space<vmem>>, vector<64x64xbf16>,
    %48 = vector.extract_strided_slice %41 {offsets = [2, 0, 0], sizes = [4, 16, 64], strides = [1, 1, 1]} : vector<6x16x64xbf16> to vector<4x16x64xbf16>
    %49 = vector.shape_cast %48 : vector<4x16x64xbf16> to vector<64x64xbf16>
    %c0_33 = arith.constant 0 : index
    %c512 = arith.constant 512 : index
    %50 = vector.load %arg10[%c0_33, %c512] : memref<64x576xbf16, #tpu.memory_space<vmem>>, vector<64x64xbf16>
    tpu.vector_store %arg10[%c0_33, %c512], %49 {strides = array<i32>} : memref<64x576xbf16, #tpu.memory_space<vmem>>, vector<64x64xbf16>,
    %c0_34 = arith.constant 0 : index
    %c0_35 = arith.constant 0 : index
    %51 = vector.load %arg10[%c0_34, %c0_35] : memref<64x576xbf16, #tpu.memory_space<vmem>>, vector<64x576xbf16>
    %c0_36 = arith.constant 0 : index
    %c0_37 = arith.constant 0 : index
    %c0_38 = arith.constant 0 : index
    %52 = vector.load %arg5[%c0_36, %c0_37, %c0_38] : memref<1x576x128xbf16, #tpu.memory_space<vmem>>, vector<1x576x128xbf16>
    %53 = vector.shape_cast %52 : vector<1x576x128xbf16> to vector<576x128xbf16>
    %cst_39 = arith.constant dense<0.000000e+00> : vector<64x128xf32>
    %54 = tpu.matmul %51, %53, %cst_39 {dimension_numbers = #tpu.dot_dimension_numbers<[1], [0], [0], [1], [0, 0, 1, 1], [], []>} : vector<64x576xbf16>, vector<576x128xbf16>, vector<64x128xf32> -> vector<64x128xf32>
    %c0_40 = arith.constant 0 : index
    %c0_41 = arith.constant 0 : index
    %55 = vector.load %arg6[%c0_40, %c0_41] : memref<1x128xf32, #tpu.memory_space<vmem>>, vector<1x128xf32>
    %56 = vector.shape_cast %55 : vector<1x128xf32> to vector<128xf32>
    %57 = vector.shape_cast %56 : vector<128xf32> to vector<1x128xf32>
    %58 = vector.broadcast %57 : vector<1x128xf32> to vector<64x128xf32>
    %59 = arith.mulf %54, %58 : vector<64x128xf32>
    %c0_42 = arith.constant 0 : index
    %c0_43 = arith.constant 0 : index
    %60 = vector.load %arg7[%c0_42, %c0_43] : memref<1x128xf32, #tpu.memory_space<vmem>>, vector<1x128xf32>
    %61 = vector.shape_cast %60 : vector<1x128xf32> to vector<128xf32>
    %62 = vector.shape_cast %61 : vector<128xf32> to vector<1x128xf32>
    %63 = vector.broadcast %62 : vector<1x128xf32> to vector<64x128xf32>
    %64 = arith.addf %59, %63 : vector<64x128xf32>
    %cst_44 = arith.constant 0.000000e+00 : f32
    %65 = vector.broadcast %cst_44 : f32 to vector<64x128xf32>
    %66 = arith.maximumf %64, %65 : vector<64x128xf32>
    %67 = vector.shape_cast %66 : vector<64x128xf32> to vector<1x4x16x128xf32>
    %68 = arith.truncf %67 : vector<1x4x16x128xf32> to vector<1x4x16x128xbf16>
    %c0_45 = arith.constant 0 : index
    %c0_46 = arith.constant 0 : index
    %c0_47 = arith.constant 0 : index
    %c0_48 = arith.constant 0 : index
    %69 = vector.load %arg8[%c0_45, %c0_46, %c0_47, %c0_48] : memref<1x4x16x128xbf16, #tpu.memory_space<vmem>>, vector<1x4x16x128xbf16>
    tpu.vector_store %arg8[%c0_45, %c0_46, %c0_47, %c0_48], %68 {strides = array<i32>} : memref<1x4x16x128xbf16, #tpu.memory_space<vmem>>, vector<1x4x16x128xbf16>,
    return
  }
  func.func @transform_0(%arg0: i32, %arg1: i32, %arg2: i32, %arg3: i32) -> (i32, i32, i32, i32) {
    %c0_i32 = arith.constant 0 : i32
    %c0_i32_0 = arith.constant 0 : i32
    %c0_i32_1 = arith.constant 0 : i32
    return %arg0, %c0_i32, %c0_i32_0, %arg3 : i32, i32, i32, i32
  }
  func.func @transform_1(%arg0: i32, %arg1: i32, %arg2: i32, %arg3: i32) -> (i32, i32, i32) {
    %c0_i32 = arith.constant 0 : i32
    %c0_i32_0 = arith.constant 0 : i32
    return %arg3, %c0_i32, %arg1 : i32, i32, i32
  }
  func.func @transform_2(%arg0: i32, %arg1: i32, %arg2: i32, %arg3: i32) -> (i32, i32) {
    %c0_i32 = arith.constant 0 : i32
    %c0_i32_0 = arith.constant 0 : i32
    return %c0_i32, %arg1 : i32, i32
  }
  func.func @transform_3(%arg0: i32, %arg1: i32, %arg2: i32, %arg3: i32) -> (i32, i32) {
    %c0_i32 = arith.constant 0 : i32
    %c0_i32_0 = arith.constant 0 : i32
    return %c0_i32, %arg1 : i32, i32
  }
  func.func @transform_4(%arg0: i32, %arg1: i32, %arg2: i32, %arg3: i32) -> (i32, i32, i32, i32) {
    %c0_i32 = arith.constant 0 : i32
    %c0_i32_0 = arith.constant 0 : i32
    return %arg0, %arg2, %c0_i32, %arg1 : i32, i32, i32, i32
  }
}

</mosaic_0001>

<bundles_post_ra>
// kernel: tpu_custom_call.1
= control target key start
LH: loop header
LB: loop body
LE: loop exit
PB: predicated region body
PF: predicated region fallthrough
CT: control target
= control target key end

     0   :  { %9 = vsyncpa [#allocation5], 0  ;;  %s2944_s0 = inlined_call_operand.hbm [shape: bf16[1,16,16,64], index: 0, kind: input, shape index: {}]   ;;  %s2945_s1 = inlined_call_operand.hbm [shape: bf16[1,576,128], index: 1, kind: input, shape index: {}]   ;;  %s2946_s2 = inlined_call_operand.vmem [shape: f32[1,128], index: 2, kind: input, shape index: {}]   ;;  %s2947_s3 = inlined_call_operand.vmem [shape: f32[1,128], index: 3, kind: input, shape index: {}]   ;;  %s2948_s4 = inlined_call_operand.hbm [shape: bf16[1,16,16,128], index: 4, kind: output, shape index: {}]  }
   0x1   :  { %10 = vsyncpa [#allocation8], 0 }
   0x2   :  { %11 = vsyncpa [#allocation6], 0 }
   0x3   :  { %13 = vsyncpa [#allocation6 + $0x1], 0  ;;  %s2413_s15 = smov 0   ;;  %s2415_s16 = smov 0  }
   0x4   :  { %s2417_s17 = smov 0   ;;  %s2419_s18 = smov 0  }
   0x5   :  { %s2421_s19 = smov 0   ;;  %s2423_s20 = smov 0  }
   0x6 LB: > { %s1842_s21 = sadd.s32 4294967295, %s2377_s20   ;;  %s1843_s22 = sadd.s32 4294967294, %s2377_s20   ;;  %s2377_s20 = sphi %s2423_s20, %s19_s20   ;;  %s2373_s19 = sphi %s2421_s19, %s2973_s19   ;;  %s2369_s18 = sphi %s2419_s18, %s2972_s18   ;;  %s2365_s17 = sphi %s2417_s17, %s2971_s17   ;;  %s2361_s16 = sphi %s2415_s16, %s2970_s16   ;;  %s2357_s15 = sphi %s2413_s15, %s2969_s15  }
   0x7   : > { %s37_s23 = sadd.s32 1, %s2373_s19  ;;  %s164_s24 = sadd.s32 1, %s2365_s17 }
   0x8   : > { %p39_p0 = scmp.ge.s32.totalorder %s37_s23, 4  ;;  %p174_p1 = scmp.ne.s32.totalorder %s2365_s17, %s2361_s16 }
   0x9   : > { %p175_p2 = scmp.eq.s32.totalorder %s1842_s21, 3  ;;  %p180_p3 = scmp.ne.s32.totalorder %s2361_s16, %s2357_s15 }
   0xa   : > { %s2975_s23 = smov (%p39_p0, %s37_s23), 0  ;;  %p181_p5 = scmp.eq.s32.totalorder %s1843_s22, 3 }
   0xb   : > { %p2453_p4 = por %p175_p2, %p174_p1  ;;  %s158_s26 = ssub.s32 %s2373_s19, %s2975_s23 }
   0xc   : > { %p1844_p6 = scmp.ge.s32.totalorder %s2377_s20, 1  ;;  %p162_p7 = scmp.eq.s32.totalorder %s158_s26, 0 }
   0xd   : > { %s2950_s25 = scalar_select %p2453_p4, 1, 0 }
   0xe   : > { %p2460_p8 = por %p181_p5, %p180_p3  ;;  %p188_p9 = scmp.lt.s32.totalorder %s2377_s20, 5 }
   0xf   : > { %s2466_s28 = scalar_select %p162_p7, %s2365_s17, %s164_s24  }
  0x10   : > { %s2951_s27 = scalar_select %p2460_p8, 1, 0 }
  0x11   : > { %p2468_p10 = pnand %p1844_p6, %p188_p9  ;;  %p2472_p11 = scmp.eq.s32.totalorder %s1842_s21, 0 }
  0x12   : > { %s2379_s5 = smov [#allocation4]   ;;  %s2380_s8 = smov [#allocation7]  }
  0x13   : > { %p2108_p12 = pneg %p2468_p10  ;;  %s204_s6 = sshll.u32 %s2379_s5, 4  ;;  %s205_s6 = int_to_ptr.vmem [resolvable:$true] %s204_s6 }
  0x14   : > { %s221_s9 = sshll.u32 %s2380_s8, 4  ;;  %s2252_s10 = scalar_lea.vmem %s205_s6, 2048  ;;  %s222_s9 = int_to_ptr.vmem [resolvable:$true] %s221_s9 }
  0x15   : > { %p2480_p13 = pnand %p2472_p11, %p2108_p12  ;;  %p2253_p1 = scmp.ne.s32.totalorder %s205_s6, %s2252_s10 }
  0x16   : > { %p2260_p5 = scmp.lt.s32.totalorder %s205_s6, %s205_s6  ;;  %p2261_p6 = scmp.lt.s32.totalorder %s2252_s10, %s2252_s10 }
  0x17   : > { %p2243_p0 = pneg %p2480_p13 }
  0x18   : > { %p2262_p7 = por %p2261_p6, %p2260_p5 }
  0x19   : > { %p2255_p2 = pnand %p2253_p1, %p2243_p0 }
  0x1b   : > { %p2256_p3 = pneg %p2255_p2 }
  0x1d   : > { %p2263_p9 = pnand %p2262_p7, %p2256_p3 }
  0x1f   : > { %2266 = shalt.err (!%p2263_p9)
}
  0x20   : > { %s2381_s11 = smov 64   ;;  %s2382_s12 = smov 4  }
  0x21   : > { %2111 = dma.hbm_to_vmem [thread:$0]  (!%p2480_p13), %s2944_s0, 2048, %s205_s6, [#allocation5], %s2381_s11, %s2381_s11, %s2382_s12  }
  0x22   : > { %s2278_s21 = scalar_lea.vmem %s222_s9, 4608  ;;  %p2286_p8 = scmp.lt.s32.totalorder %s222_s9, %s222_s9 }
  0x23   : > { %p2279_p12 = scmp.ne.s32.totalorder %s222_s9, %s2278_s21  ;;  %p2287_p4 = scmp.lt.s32.totalorder %s2278_s21, %s2278_s21 }
  0x25   : > { %p2281_p1 = pnand %p2279_p12, %p2243_p0  ;;  %p2288_p5 = por %p2287_p4, %p2286_p8 }
  0x27   : > { %p2282_p2 = pneg %p2281_p1 }
  0x29   : > { %p2289_p3 = pnand %p2288_p5, %p2282_p2 }
  0x2b   : > { %2292 = shalt.err (!%p2289_p3)
}
  0x2c   : > { %2114 = dma.hbm_to_vmem [thread:$0]  (!%p2480_p13), %s2945_s1, 4608, %s222_s9, [#allocation8], %s2381_s11, %s2381_s11, %s2382_s12  }
  0x2d   : > { %249 = sbr.rel (%p2468_p10) target bundleno = 549 (0x225), region = 36 }
  0x32   : > { %2344 = dma.done.wait (%p2472_p11), [#allocation5], 2048  }
  0x33   : > { %2346 = vsyncadd (%p2472_p11), [#allocation5], 4294965248 }
  0x34   : > { %2348 = dma.done.wait (%p2472_p11), [#allocation8], 4608  }
  0x35   : > { %2350 = vsyncadd (%p2472_p11), [#allocation8], 4294962688  ;;  %s277_s26 = sand.u32 1, %s2361_s16   ;;  %s1853_s5 = sshll.u32 %s2369_s18, 2  ;;  %vm289_vm0 = vcmask 516096   ;;  %vm424_vm6 = vcmask 519168  }
  0x36   : > { %s2515_s29 = sshll.u32 %s277_s26, 5  ;;  %vm290_vm1 = vsmask.f32 256  ;;  %vm310_vm2 = vsmask.f32 7938  ;;  %s1950_s30 = sshll.u32 %s2369_s18, 5 }
  0x37   : > { %vm2519_vm3 = vmand %vm289_vm0, %vm290_vm1  ;;  %vm341_vm5 = vsmask.f32 4368  ;;  %v295_v2 = vld [vmem:[#allocation2 + $0xc] sm:$0x1]  ;;  %v298_v3 = vld [vmem:[#allocation2 + $0x18] sm:$0x1] }
  0x38   : > { %vm2524_vm4 = vmand %vm289_vm0, %vm310_vm2  ;;  %v301_v4 = vld [vmem:[#allocation2 + $0x24] sm:$0x1]  ;;  %v296_v5 = vsel %vm2519_vm3, 0, %v295_v2  ;;  %v299_v6 = vsel %vm2519_vm3, 0, %v298_v3  ;;  %v304_v8 = vld [vmem:[#allocation2 + $0x30] sm:$0x1] }
  0x39   : > { %v302_v7 = vsel %vm2519_vm3, 0, %v301_v4  ;;  %297 = vst [vmem:[#allocation2 + $0xc] sm:$0x1] %v296_v5  ;;  %300 = vst [vmem:[#allocation2 + $0x18] sm:$0x1] %v299_v6  ;;  %v305_v9 = vsel %vm2519_vm3, 0, %v304_v8 }
  0x3a   : > { %303 = vst [vmem:[#allocation2 + $0x24] sm:$0x1] %v302_v7  ;;  %v315_v10 = vld [vmem:[#allocation2 + $0x14] sm:$0x1]  ;;  %v318_v11 = vld [vmem:[#allocation2 + $0x20] sm:$0x1]  ;;  %vm2564_vm7 = vmand %vm424_vm6, %vm310_vm2 }
  0x3b   : > { %306 = vst [vmem:[#allocation2 + $0x30] sm:$0x1] %v305_v9  ;;  %v316_v12 = vsel %vm2524_vm4, 0, %v315_v10  ;;  %v319_v13 = vsel %vm2524_vm4, 0, %v318_v11  ;;  %v321_v14 = vld [vmem:[#allocation2 + $0x2c] sm:$0x1]  ;;  %vm2570_vm8 = vmor %vm290_vm1, %vm341_vm5 }
  0x3c   : > { %v324_v15 = vld [vmem:[#allocation2 + $0x38] sm:$0x1]  ;;  %317 = vst [vmem:[#allocation2 + $0x14] sm:$0x1] %v316_v12  ;;  %320 = vst [vmem:[#allocation2 + $0x20] sm:$0x1] %v319_v13 }
  0x3d   : > { %v322_v16 = vsel %vm2524_vm4, 0, %v321_v14  ;;  %v325_v17 = vsel %vm2524_vm4, 0, %v324_v15  ;;  %v292_v18 = vld [vmem:[#allocation2] sm:$0x1]  ;;  %v307_v19 = vld [vmem:[#allocation2 + $0x3c] sm:$0x1] }
  0x3e   : > { %323 = vst [vmem:[#allocation2 + $0x2c] sm:$0x1] %v322_v16  ;;  %326 = vst [vmem:[#allocation2 + $0x38] sm:$0x1] %v325_v17  ;;  %v293_v20 = vsel %vm2519_vm3, 0, %v292_v18  ;;  %v308_v21 = vsel %vm2519_vm3, 0, %v307_v19 }
  0x3f   : > { %v312_v22 = vld [vmem:[#allocation2 + $0x8] sm:$0x1]  ;;  %v327_v23 = vld [vmem:[#allocation2 + $0x44] sm:$0x1]  ;;  %294 = vst [vmem:[#allocation2] sm:$0x1] %v293_v20 }
  0x40   : > { %309 = vst [vmem:[#allocation2 + $0x3c] sm:$0x1] %v308_v21  ;;  %v313_v24 = vsel %vm2524_vm4, 0, %v312_v22  ;;  %v328_v25 = vsel %vm2524_vm4, 0, %v327_v23  ;;  %s2555_s6 = scalar_lea.vmem [#allocation4], %s1950_s30  ;;  %s2606_s7 = scalar_lea.vmem [#allocation9], %s2515_s29 }
  0x41   : > { %v333_v26 = vld [vmem:[%s2555_s6] sm:$0xf]  ;;  %v334_v27 = vld [vmem:[%s2555_s6 + $0x4] sm:$0xf]  ;;  %314 = vst [vmem:[#allocation2 + $0x8] sm:$0x1] %v313_v24 }
  0x42   : > { %329 = vst [vmem:[#allocation2 + $0x44] sm:$0x1] %v328_v25  ;;  %v344_v28 = vshrl.u32 %v333_v26, 16  ;;  %v347_v29 = vshll.u32 %v333_v26, 16  ;;  %v352_v30 = vshrl.u32 %v334_v27, 16  ;;  %v355_v31 = vshll.u32 %v334_v27, 16 }
  0x43   : > { %v335_v32 = vld [vmem:[%s2555_s6 + $0x8] sm:$0xf]  ;;  %v336_v35 = vld [vmem:[%s2555_s6 + $0xc] sm:$0xf]  ;;  %v337_v36 = vld [vmem:[%s2555_s6 + $0x10] sm:$0xf] }
  0x44   : > { %v361_v33 = vshrl.u32 %v335_v32, 16  ;;  %v364_v34 = vshll.u32 %v335_v32, 16  ;;  %v346_v37 = vrot.slane %v344_v28, 7  ;;  %v354_v39 = vrot.slane %v352_v30, 7  ;;  %v426_v40 = vld [vmem:[#allocation2 + $0xc] sm:$0xf] }
  0x45   : > { %v369_v43 = vshrl.u32 %v336_v35, 16  ;;  %v372_v44 = vshll.u32 %v336_v35, 16  ;;  %v378_v45 = vshrl.u32 %v337_v36, 16  ;;  %v431_v50 = vld [vmem:[#allocation2 + $0x14] sm:$0x1]  ;;  %v381_v61 = vshll.u32 %v337_v36, 16 }
  0x46   : > { %v363_v42 = vrot.slane %v361_v33, 7  ;;  %v349_v46 = vor.u32 %v347_v29, %v346_v37  ;;  %v350_v47 = vrot.slane %v346_v37, 4  ;;  %v357_v48 = vor.u32 %v355_v31, %v354_v39  ;;  %v434_v51 = vld [vmem:[#allocation2 + $0x18] sm:$0xf]  ;;  %v338_v56 = vld [vmem:[%s2555_s6 + $0x14] sm:$0xf] }
  0x47   : > { %v359_v49 = vrot.slane %v354_v39, 4  ;;  %v371_v54 = vrot.slane %v369_v43, 7  ;;  %v380_v55 = vrot.slane %v378_v45, 7  ;;  %v438_v60 = vld [vmem:[#allocation2 + $0x20] sm:$0x1]  ;;  %v386_v7 = vshrl.u32 %v338_v56, 16 }
  0x48   : > { %v366_v52 = vor.u32 %v364_v34, %v363_v42  ;;  %v367_v53 = vrot.slane %v363_v42, 4  ;;  %v427_v57 = vsel %vm2564_vm7, %v349_v46, %v426_v40  ;;  %v358_v58 = vsel %vm2570_vm8, %v350_v47, %v357_v48  ;;  %v339_v62 = vld [vmem:[%s2555_s6 + $0x18] sm:$0xf]  ;;  %v441_v3 = vld [vmem:[#allocation2 + $0x24] sm:$0xf]  ;;  %p1856_p4 = scmp.ne.s32.totalorder %s2369_s18, 0 }
  0x49   : > { %v432_v59 = vsel %vm2519_vm3, %v359_v49, %v431_v50  ;;  %428 = vst [vmem:[#allocation2 + $0xc] sm:$0xf] %v427_v57  ;;  %430 = vst.msk [vmem:[#allocation2 + $0x10] sm:$0xf] %vm424_vm6, %v358_v58  ;;  %v374_v1 = vor.u32 %v372_v44, %v371_v54  ;;  %v376_v2 = vrot.slane %v371_v54, 4  ;;  %v384_v4 = vrot.slane %v380_v55, 4 }
  0x4a   : > { %433 = vst [vmem:[#allocation2 + $0x14] sm:$0x1] %v432_v59  ;;  %v435_v63 = vsel %vm2564_vm7, %v366_v52, %v434_v51  ;;  %v340_v5 = vld [vmem:[%s2555_s6 + $0x1c] sm:$0xf]  ;;  %v383_v6 = vor.u32 %v381_v61, %v380_v55  ;;  %v389_v8 = vshll.u32 %v338_v56, 16  ;;  %v395_v9 = vshrl.u32 %v339_v62, 16 }
  0x4b   : > { %436 = vst [vmem:[#allocation2 + $0x18] sm:$0xf] %v435_v63  ;;  %v375_v10 = vsel %vm2570_vm8, %v367_v53, %v374_v1  ;;  %v439_v11 = vsel %vm2519_vm3, %v376_v2, %v438_v60  ;;  %v398_v12 = vshll.u32 %v339_v62, 16  ;;  %v403_v13 = vshrl.u32 %v340_v5, 16  ;;  %v445_v18 = vld [vmem:[#allocation2 + $0x2c] sm:$0x1] }
  0x4c   : > { %437 = vst.msk [vmem:[#allocation2 + $0x1c] sm:$0xf] %vm424_vm6, %v375_v10  ;;  %440 = vst [vmem:[#allocation2 + $0x20] sm:$0x1] %v439_v11  ;;  %v442_v14 = vsel %vm2564_vm7, %v383_v6, %v441_v3  ;;  %v388_v15 = vrot.slane %v386_v7, 7  ;;  %v397_v16 = vrot.slane %v395_v9, 7 }
  0x4d   : > { %v406_v17 = vshll.u32 %v340_v5, 16  ;;  %443 = vst [vmem:[#allocation2 + $0x24] sm:$0xf] %v442_v14  ;;  %v448_v19 = vld [vmem:[#allocation2 + $0x30] sm:$0xf]  ;;  %v405_v20 = vrot.slane %v403_v13, 7 }
  0x4e   : > { %v391_v21 = vor.u32 %v389_v8, %v388_v15  ;;  %v393_v22 = vrot.slane %v388_v15, 4  ;;  %v400_v23 = vor.u32 %v398_v12, %v397_v16  ;;  %v401_v24 = vrot.slane %v397_v16, 4  ;;  %v452_v25 = vld [vmem:[#allocation2 + $0x38] sm:$0x1] }
  0x4f   : > { %v408_v26 = vor.u32 %v406_v17, %v405_v20  ;;  %v410_v27 = vrot.slane %v405_v20, 4  ;;  %458 = sbr.rel (%p1856_p4) target bundleno = 87 (0x57), region = 48 }
  0x50   : > { %v392_v28 = vsel %vm2570_vm8, %v384_v4, %v391_v21  ;;  %v446_v29 = vsel %vm2519_vm3, %v393_v22, %v445_v18  ;;  %v449_v30 = vsel %vm2564_vm7, %v400_v23, %v448_v19 }
  0x51   : > { %444 = vst.msk [vmem:[#allocation2 + $0x28] sm:$0xf] %vm424_vm6, %v392_v28  ;;  %447 = vst [vmem:[#allocation2 + $0x2c] sm:$0x1] %v446_v29  ;;  %v409_v31 = vsel %vm2570_vm8, %v401_v24, %v408_v26  ;;  %v453_v32 = vsel %vm2519_vm3, %v410_v27, %v452_v25 }
  0x52   : > { %450 = vst [vmem:[#allocation2 + $0x30] sm:$0xf] %v449_v30  ;;  %451 = vst.msk [vmem:[#allocation2 + $0x34] sm:$0xf] %vm424_vm6, %v409_v31 }
  0x53   : > { %454 = vst [vmem:[#allocation2 + $0x38] sm:$0x1] %v453_v32 }
  0x54   : > { %v459_v33 = vld [vmem:[#allocation2] sm:$0xf]  ;;  %v463_v34 = vld [vmem:[#allocation2 + $0x8] sm:$0x1]  ;;  %v2383_v36 = vmov 0  }
  0x55   : > { %v460_v35 = vsel %vm2564_vm7, 0, %v459_v33  ;;  %462 = vst.msk [vmem:[#allocation2 + $0x4] sm:$0xf] %vm424_vm6, %v2383_v36  ;;  %v464_v37 = vsel %vm2519_vm3, 0, %v463_v34 }
  0x56   : > { %461 = vst [vmem:[#allocation2] sm:$0xf] %v460_v35  ;;  %465 = vst [vmem:[#allocation2 + $0x8] sm:$0x1] %v464_v37 }
  0x57 PF: > { %p1857_p8 = scmp.le.s32.totalorder %s2369_s18, 0 }
  0x58   : > { %s1858_s8 = sadd.s32 (!%p1857_p8), 4294967295, %s1853_s5 }
  0x59   : > { %469 = sbr.rel (%p1857_p8) target bundleno = 104 (0x68), region = 52  ;;  %s1951_s9 = sshll.u32 (!%p1857_p8), %s1858_s8, 3 }
  0x5a   : > { %s473_s10 = scalar_lea.vmem (!%p1857_p8), [#allocation4], %s1951_s9 }
  0x5e   : > { %v474_v39 = vld [vmem:[%s473_s10] sm:$0xf]  ;;  %v475_v40 = vld [vmem:[%s473_s10 + $0x4] sm:$0xf]  ;;  %v500_v49 = vld [vmem:[#allocation2 + $0x8] sm:$0x1] }
  0x5f   : > { %v477_v42 = vshrl.u32 %v474_v39, 16  ;;  %v480_v43 = vshll.u32 %v474_v39, 16  ;;  %v485_v44 = vshrl.u32 %v475_v40, 16  ;;  %v488_v45 = vshll.u32 %v475_v40, 16  ;;  %v496_v48 = vld [vmem:[#allocation2] sm:$0xf] }
  0x61   : > { %v479_v46 = vrot.slane %v477_v42, 7  ;;  %v487_v47 = vrot.slane %v485_v44, 7 }
  0x63   : > { %v482_v50 = vor.u32 %v480_v43, %v479_v46  ;;  %v483_v51 = vrot.slane %v479_v46, 4  ;;  %v490_v52 = vor.u32 %v488_v45, %v487_v47  ;;  %v492_v53 = vrot.slane %v487_v47, 4 }
  0x65   : > { %v497_v54 = vsel %vm2564_vm7, %v482_v50, %v496_v48  ;;  %v491_v55 = vsel %vm2570_vm8, %v483_v51, %v490_v52  ;;  %v501_v56 = vsel %vm2519_vm3, %v492_v53, %v500_v49 }
  0x66   : > { %498 = vst [vmem:[#allocation2] sm:$0xf] %v497_v54  ;;  %499 = vst.msk [vmem:[#allocation2 + $0x4] sm:$0xf] %vm424_vm6, %v491_v55 }
  0x67   : > { %502 = vst [vmem:[#allocation2 + $0x8] sm:$0x1] %v501_v56 }
  0x68 PF: > { %p1861_p10 = scmp.ne.s32.totalorder %s2369_s18, 3 }
  0x6a   : > { %506 = sbr.rel (%p1861_p10) target bundleno = 114 (0x72), region = 56 }
  0x6f   : > { %v508_v57 = vld [vmem:[#allocation2 + $0x3c] sm:$0xf]  ;;  %v512_v58 = vld [vmem:[#allocation2 + $0x44] sm:$0x1]  ;;  %v2384_v60 = vmov 0  }
  0x70   : > { %v509_v59 = vsel %vm2564_vm7, 0, %v508_v57  ;;  %511 = vst.msk [vmem:[#allocation2 + $0x40] sm:$0xf] %vm424_vm6, %v2384_v60  ;;  %v513_v61 = vsel %vm2519_vm3, 0, %v512_v58 }
  0x71   : > { %510 = vst [vmem:[#allocation2 + $0x3c] sm:$0xf] %v509_v59  ;;  %514 = vst [vmem:[#allocation2 + $0x44] sm:$0x1] %v513_v61 }
  0x72 PF: > { %p1862_p11 = scmp.ge.s32.totalorder %s2369_s18, 3 }
  0x74   : > { %518 = sbr.rel (%p1862_p11) target bundleno = 131 (0x83), region = 60 }
  0x79   : > { %v1865_v62 = vld [vmem:[%s2555_s6 + $0x20] sm:$0xf]  ;;  %v1866_v63 = vld [vmem:[%s2555_s6 + $0x24] sm:$0xf]  ;;  %v546_v7 = vld [vmem:[#allocation2 + $0x3c] sm:$0xf] }
  0x7a   : > { %v526_v1 = vshrl.u32 %v1865_v62, 16  ;;  %v529_v2 = vshll.u32 %v1865_v62, 16  ;;  %v534_v3 = vshrl.u32 %v1866_v63, 16  ;;  %v537_v4 = vshll.u32 %v1866_v63, 16  ;;  %v550_v8 = vld [vmem:[#allocation2 + $0x44] sm:$0x1] }
  0x7c   : > { %v528_v5 = vrot.slane %v526_v1, 7  ;;  %v536_v6 = vrot.slane %v534_v3, 7 }
  0x7e   : > { %v531_v9 = vor.u32 %v529_v2, %v528_v5  ;;  %v532_v10 = vrot.slane %v528_v5, 4  ;;  %v539_v11 = vor.u32 %v537_v4, %v536_v6  ;;  %v541_v12 = vrot.slane %v536_v6, 4 }
  0x80   : > { %v547_v13 = vsel %vm2564_vm7, %v531_v9, %v546_v7  ;;  %v540_v14 = vsel %vm2570_vm8, %v532_v10, %v539_v11  ;;  %v551_v15 = vsel %vm2519_vm3, %v541_v12, %v550_v8 }
  0x81   : > { %548 = vst [vmem:[#allocation2 + $0x3c] sm:$0xf] %v547_v13  ;;  %549 = vst.msk [vmem:[#allocation2 + $0x40] sm:$0xf] %vm424_vm6, %v540_v14 }
  0x82   : > { %552 = vst [vmem:[#allocation2 + $0x44] sm:$0x1] %v551_v15 }
  0x83 PF: > { %v555_v16 = vld [vmem:[#allocation2 + $0xc] sm:$0xf]  ;;  %v556_v17 = vld [vmem:[#allocation2 + $0x10] sm:$0xf]  ;;  %vm885_vm9 = vcmask 1042432   ;;  %s2385_s11 = smov 64  }
  0x84   : > { %581 = vrot.lane.b32.xlu0 %v555_v16, %s2385_s11  ;;  %567 = vst.msk [vmem:[#allocation3 + $0x28] sm:$0xf] %vm424_vm6, %v555_v16  ;;  %568 = vst.msk [vmem:[#allocation3 + $0x3c] sm:$0xf] %vm424_vm6, %v556_v17  ;;  %v622_v38 = vld [vmem:[#allocation2] sm:$0xf] }
  0x85   : > { %v623_v41 = vld [vmem:[#allocation2 + $0x4] sm:$0xf]  ;;  %vm640_vm10 = vsmask.f32 3328  ;;  %vm641_vm11 = vsmask.f32 7440 }
  0x86   : > { %v644_v0 = vshrl.u32 %v622_v38, 16  ;;  %v647_v18 = vshll.u32 %v622_v38, 16  ;;  %v653_v19 = vshll.u32 %v623_v41, 16  ;;  %v2180_v20 = vld [vmem:[#allocation7 + $0x78] sm:$0xff]   ;;  %v657_v21 = vshrl.u32 %v623_v41, 16  ;;  %vm2646_vm13 = vmor %vm640_vm10, %vm641_vm11  ;;  %v2182_v48 = vld [vmem:[#allocation7 + $0x70] sm:$0xff]  }
  0x87   : > { %v628_v22 = vld [vmem:[#allocation2 + $0x18] sm:$0xf]  ;;  %v629_v23 = vld [vmem:[#allocation2 + $0x1c] sm:$0xf]  ;;  %vm886_vm12 = vcmask 1046532   ;;  %1986 = vmatprep.subr.bf16.mxu0 %v2180_v20  ;;  %v2181_v40 = vld [vmem:[#allocation7 + $0x38] sm:$0xff]  }
  0x88   : > { %v646_v24 = vrot.slane %v644_v0, 4  ;;  %v649_v25 = vrot.slane %v647_v18, 5  ;;  %v655_v26 = vrot.slane %v653_v19, 5  ;;  %v692_v27 = vshrl.u32 %v628_v22, 16  ;;  %v624_v28 = vld [vmem:[#allocation2 + $0x8] sm:$0x1]  ;;  %583 = vrot.lane.b32.xlu0 %v556_v17, %s2385_s11  ;;  %vm2652_vm14 = vmor %vm885_vm9, %vm886_vm12  ;;  %1987 = vmatpush3.bf16.msra.mxu0 %v2181_v40 }
  0x89   : > { %v659_v29 = vrot.slane %v657_v21, 4  ;;  %v695_v30 = vshll.u32 %v628_v22, 16  ;;  %v701_v31 = vshll.u32 %v629_v23, 16  ;;  %v705_v32 = vshrl.u32 %v629_v23, 16  ;;  %v858_v33 = vld [vmem:[#allocation2 + $0xc] sm:$0xe]  ;;  %1988 = vmatprep.subr.bf16.mxu0 %v2182_v48 }
  0x8a   : > { %v650_v34 = vor.u32 %v649_v25, %v646_v24  ;;  %v694_v35 = vrot.slane %v692_v27, 4  ;;  %v663_v36 = vshll.u32 %v624_v28, 16  ;;  %v859_v37 = vld [vmem:[#allocation2 + $0x10] sm:$0xf]  ;;  %v1868_v39 = vrot.slane %v858_v33, 9  ;;  %v2183_v8 = vld [vmem:[#allocation7 + $0x30] sm:$0xff]  }
  0x8b   : > { %v697_v43 = vrot.slane %v695_v30, 5  ;;  %v703_v44 = vrot.slane %v701_v31, 5  ;;  %v660_v45 = vor.u32 %v659_v29, %v655_v26  ;;  %v897_v46 = vrot.slane %v859_v37, 5  ;;  %v630_v47 = vld [vmem:[#allocation2 + $0x20] sm:$0x1]  ;;  %v2184_v14 = vld [vmem:[#allocation7 + $0x68] sm:$0xff]  }
  0x8c   : > { %v651_v49 = vrot.slane %v650_v34, 4  ;;  %v665_v50 = vrot.slane %v663_v36, 5  ;;  %v707_v52 = vrot.slane %v705_v32, 4  ;;  %v711_v53 = vshll.u32 %v630_v47, 16  ;;  %v2656_v54 = vld [vmem:[#allocation2 + $0x18] sm:$0xf]  ;;  %1989 = vmatpush3.bf16.msra.mxu0 %v2183_v8 }
  0x8d   : > { %v698_v55 = vor.u32 %v697_v43, %v694_v35  ;;  %v661_v56 = vrot.slane %v660_v45, 4  ;;  %569 = vst.msk [vmem:[#allocation3 + $0x50] sm:$0xf] %vm424_vm6, %v2656_v54  ;;  %614 = vst.msk [vmem:[#allocation3 + $0xc] sm:$0xf] %vm424_vm6, %v2656_v54  ;;  %v2664_v58 = vrot.slane %v897_v46, 4  ;;  %v2674_v4 = vsel %vm2652_vm14, %v1868_v39, %v897_v46  ;;  %1990 = vmatprep.subr.bf16.mxu0 %v2184_v14 }
  0x8e   : > { %v2662_v57 = vld [vmem:[#allocation2 + $0x14] sm:$0x1]  ;;  %v625_v59 = vld [vmem:[#allocation2 + $0xc] sm:$0xf]  ;;  %v656_v60 = vsel %vm2646_vm13, %v651_v49, %v655_v26  ;;  %v708_v61 = vor.u32 %v707_v52, %v703_v44  ;;  %v713_v62 = vrot.slane %v711_v53, 5  ;;  %v2185_v0 = vld [vmem:[#allocation7 + $0xf8] sm:$0xff]  }
  0x8f   : > { %v900_v63 = vrot.slane %v2662_v57, 5  ;;  %v626_v1 = vld [vmem:[#allocation2 + $0x10] sm:$0xf]  ;;  %v2669_v2 = vld [vmem:[#allocation2 + $0x1c] sm:$0xf]  ;;  %739 = vrot.lane.b32.xlu1 %v656_v60, %s2385_s11  ;;  %v699_v3 = vrot.slane %v698_v55, 4  ;;  %v666_v9 = vsel %vm2646_vm13, %v661_v56, %v665_v50  ;;  %2026 = vmatprep.subr.bf16.mxu1 %v2185_v0 }
  0x90   : > { %v668_v5 = vshrl.u32 %v625_v59, 16  ;;  %v671_v6 = vshll.u32 %v625_v59, 16  ;;  %570 = vst.msk [vmem:[#allocation3 + $0x64] sm:$0xf] %vm424_vm6, %v2669_v2  ;;  %615 = vst.msk [vmem:[#allocation3 + $0x20] sm:$0xf] %vm424_vm6, %v2669_v2 }
  0x91   : > { %v631_v7 = vld [vmem:[#allocation2 + $0x24] sm:$0xf]  ;;  %v709_v10 = vrot.slane %v708_v61, 4  ;;  %v677_v11 = vshll.u32 %v626_v1, 16  ;;  %v681_v12 = vshrl.u32 %v626_v1, 16  ;;  %v704_v15 = vsel %vm2646_vm13, %v699_v3, %v703_v44  ;;  %v2186_v23 = vld [vmem:[#allocation7 + $0x28] sm:$0xff]  }
  0x92   : > { %v632_v13 = vld [vmem:[#allocation2 + $0x28] sm:$0xf]  ;;  %v670_v16 = vrot.slane %v668_v5, 4  ;;  %v673_v17 = vrot.slane %v671_v6, 5  ;;  %v716_v38 = vshrl.u32 %v631_v7, 16  ;;  %747 = vrot.lane.b32.xlu0 %v704_v15, %s2385_s11  ;;  %v719_v20 = vshll.u32 %v631_v7, 16  ;;  %1991 = vmatpush3.bf16.msra.mxu0 %v2186_v23 }
  0x93   : > { %v627_v41 = vld [vmem:[#allocation2 + $0x14] sm:$0x1]  ;;  %805 = vst.msk [vmem:[#allocation3 + $0x30] sm:$0xf] %vm424_vm6, %v704_v15  ;;  %v714_v18 = vsel %vm2646_vm13, %v709_v10, %v713_v62  ;;  %v679_v19 = vrot.slane %v677_v11, 5  ;;  %v725_v21 = vshll.u32 %v632_v13, 16  ;;  %741 = vrot.lane.b32.xlu1 %v666_v9, %s2385_s11  ;;  %v2697_v44 = vsel %vm2652_vm14, %v2664_v58, %v900_v63 }
  0x94   : > { %v861_v22 = vld [vmem:[#allocation2 + $0x18] sm:$0xe]  ;;  %806 = vst.msk [vmem:[#allocation3 + $0x44] sm:$0xf] %vm424_vm6, %v714_v18  ;;  %v674_v24 = vor.u32 %v673_v17, %v670_v16  ;;  %v718_v25 = vrot.slane %v716_v38, 4  ;;  %v729_v26 = vshrl.u32 %v632_v13, 16 }
  0x95   : > { %v683_v27 = vrot.slane %v681_v12, 4  ;;  %v862_v28 = vld [vmem:[#allocation2 + $0x1c] sm:$0xf]  ;;  %v2187_v29 = vld [vmem:[#allocation7 + $0xb8] sm:$0xff]   ;;  %v721_v30 = vrot.slane %v719_v20, 5  ;;  %v727_v31 = vrot.slane %v725_v21, 5 }
  0x96   : > { %v687_v32 = vshll.u32 %v627_v41, 16  ;;  %v1869_v33 = vrot.slane %v861_v22, 9  ;;  %v633_v34 = vld [vmem:[#allocation2 + $0x2c] sm:$0x1]  ;;  %v675_v35 = vrot.slane %v674_v24, 4  ;;  %v904_v37 = vrot.slane %v862_v28, 5  ;;  %2027 = vmatpush3.bf16.msra.mxu1 %v2187_v29  ;;  %942 = vrot.lane.b32.xlu0 %v2674_v4, %s2385_s11 }
  0x97   : > { %v684_v36 = vor.u32 %v683_v27, %v679_v19  ;;  %v731_v39 = vrot.slane %v729_v26, 4  ;;  %v2690_v40 = vld [vmem:[#allocation2 + $0x24] sm:$0xf]  ;;  %v2188_v43 = vld [vmem:[#allocation7 + $0x60] sm:$0xff]   ;;  %v722_v45 = vor.u32 %v721_v30, %v718_v25  ;;  %v735_v47 = vshll.u32 %v633_v34, 16  ;;  %749 = vrot.lane.b32.xlu1 %v714_v18, %s2385_s11  ;;  %v2189_v58 = vld [vmem:[#allocation7 + $0xf0] sm:$0xff]  }
  0x98   : > { %v689_v46 = vrot.slane %v687_v32, 5  ;;  %571 = vst.msk [vmem:[#allocation3 + $0x78] sm:$0xf] %vm424_vm6, %v2690_v40  ;;  %616 = vst.msk [vmem:[#allocation3 + $0x34] sm:$0xf] %vm424_vm6, %v2690_v40  ;;  %v680_v50 = vsel %vm2646_vm13, %v675_v35, %v679_v19  ;;  %v2708_v53 = vsel %vm2652_vm14, %v1869_v33, %v904_v37  ;;  %1992 = vmatprep.subr.bf16.mxu0 %v2188_v43  ;;  %v906_v61 = vrot.slane %v904_v37, 4 }
  0x99   : > { %v863_v48 = vld [vmem:[#allocation2 + $0x20] sm:$0x1]  ;;  %v634_v49 = vld [vmem:[#allocation2 + $0x30] sm:$0xf]  ;;  %v685_v52 = vrot.slane %v684_v36, 4  ;;  %v732_v55 = vor.u32 %v731_v39, %v727_v31  ;;  %v723_v59 = vrot.slane %v722_v45, 4  ;;  %2028 = vmatprep.subr.bf16.mxu1 %v2189_v58 }
  0x9a   : > { %v635_v56 = vld [vmem:[#allocation2 + $0x34] sm:$0xf]  ;;  %v2710_v57 = vld [vmem:[#allocation2 + $0x28] sm:$0xf]  ;;  %803 = vst.msk [vmem:[#allocation3 + $0x8] sm:$0xf] %vm424_vm6, %v680_v50  ;;  %585 = vrot.lane.b32.xlu0 %v2656_v54, %s2385_s11 }
  0x9b   : > { %988 = vst.msk [vmem:[#allocation3 + $0x10] sm:$0xf] %vm424_vm6, %v2708_v53  ;;  %v737_v60 = vrot.slane %v735_v47, 5  ;;  %v907_v62 = vrot.slane %v863_v48, 5  ;;  %572 = vst.msk [vmem:[#allocation3 + $0x8c] sm:$0xf] %vm424_vm6, %v2710_v57  ;;  %v690_v1 = vsel %vm2646_vm13, %v685_v52, %v689_v46  ;;  %v728_v9 = vsel %vm2646_vm13, %v723_v59, %v727_v31  ;;  %944 = vrot.lane.b32.xlu1 %v2697_v44, %s2385_s11 }
  0x9c   : > { %617 = vst.msk [vmem:[#allocation3 + $0x48] sm:$0xf] %vm424_vm6, %v2710_v57  ;;  %v864_v63 = vld [vmem:[#allocation2 + $0x24] sm:$0xe]  ;;  %v733_v3 = vrot.slane %v732_v55, 4  ;;  %v772_v5 = vshrl.u32 %v634_v49, 16 }
  0x9d   : > { %v775_v6 = vshll.u32 %v634_v49, 16  ;;  %v865_v7 = vld [vmem:[#allocation2 + $0x28] sm:$0xf]  ;;  %804 = vst.msk [vmem:[#allocation3 + $0x1c] sm:$0xf] %vm424_vm6, %v690_v1  ;;  %v2728_v10 = vsel %vm2652_vm14, %v906_v61, %v907_v62  ;;  %v781_v11 = vshll.u32 %v635_v56, 16 }
  0x9e   : > { %v2190_v8 = vld [vmem:[#allocation7 + $0x20] sm:$0xff]   ;;  %v785_v12 = vshrl.u32 %v635_v56, 16  ;;  %v636_v13 = vld [vmem:[#allocation2 + $0x38] sm:$0x1]  ;;  %v2730_v14 = vld [vmem:[#allocation2 + $0x30] sm:$0xf]  ;;  %v738_v54 = vsel %vm2646_vm13, %v733_v3, %v737_v60  ;;  %743 = vrot.lane.b32.xlu0 %v680_v50, %s2385_s11 }
  0x9f   : > { %807 = vst.msk [vmem:[#allocation3 + $0x58] sm:$0xf] %vm424_vm6, %v728_v9  ;;  %989 = vst.msk [vmem:[#allocation3 + $0x24] sm:$0xf] %vm424_vm6, %v2728_v10  ;;  %v774_v15 = vrot.slane %v772_v5, 4  ;;  %v777_v16 = vrot.slane %v775_v6, 5  ;;  %1993 = vmatpush3.bf16.msra.mxu0 %v2190_v8  ;;  %587 = vrot.lane.b32.xlu1 %v2669_v2, %s2385_s11 }
  0xa0   : > { %v1870_v17 = vrot.slane %v864_v63, 9  ;;  %618 = vst.msk [vmem:[#allocation3 + $0x5c] sm:$0xf] %vm424_vm6, %v2730_v14  ;;  %v866_v38 = vld [vmem:[#allocation2 + $0x2c] sm:$0x1]  ;;  %v2191_v41 = vld [vmem:[#allocation7 + $0xb0] sm:$0xff]  }
  0xa1   : > { %808 = vst.msk [vmem:[#allocation3 + $0x6c] sm:$0xf] %vm424_vm6, %v738_v54  ;;  %v783_v0 = vrot.slane %v781_v11, 5  ;;  %v911_v18 = vrot.slane %v865_v7, 5  ;;  %v787_v19 = vrot.slane %v785_v12, 4  ;;  %v791_v20 = vshll.u32 %v636_v13, 16  ;;  %2029 = vmatpush3.bf16.msra.mxu1 %v2191_v41 }
  0xa2   : > { %v2742_v21 = vld [vmem:[#allocation2 + $0x34] sm:$0xf]  ;;  %v778_v22 = vor.u32 %v777_v16, %v774_v15  ;;  %v914_v23 = vrot.slane %v866_v38, 5  ;;  %v867_v29 = vld [vmem:[#allocation2 + $0x30] sm:$0xe]  ;;  %v2192_v34 = vld [vmem:[#allocation7 + $0x58] sm:$0xff]   ;;  %751 = vrot.lane.b32.xlu0 %v728_v9, %s2385_s11 }
  0xa3   : > { %619 = vst.msk [vmem:[#allocation3 + $0x70] sm:$0xf] %vm424_vm6, %v2742_v21  ;;  %v2749_v24 = vsel %vm2652_vm14, %v1870_v17, %v911_v18  ;;  %v788_v25 = vor.u32 %v787_v19, %v783_v0  ;;  %v793_v26 = vrot.slane %v791_v20, 5  ;;  %v913_v27 = vrot.slane %v911_v18, 4  ;;  %v868_v32 = vld [vmem:[#allocation2 + $0x34] sm:$0xf]  ;;  %1994 = vmatprep.subr.bf16.mxu0 %v2192_v34  ;;  %745 = vrot.lane.b32.xlu1 %v690_v1, %s2385_s11 }
  0xa4   : > { %v779_v28 = vrot.slane %v778_v22, 4  ;;  %990 = vst.msk [vmem:[#allocation3 + $0x38] sm:$0xf] %vm424_vm6, %v2749_v24  ;;  %v869_v33 = vld [vmem:[#allocation2 + $0x38] sm:$0x1]  ;;  %v2193_v2 = vld [vmem:[#allocation7 + $0xe8] sm:$0xff]  }
  0xa5   : > { %v789_v30 = vrot.slane %v788_v25, 4  ;;  %v2757_v31 = vsel %vm2652_vm14, %v913_v27, %v914_v23  ;;  %v637_v37 = vld [vmem:[#allocation2 + $0x3c] sm:$0xf]  ;;  %v638_v39 = vld [vmem:[#allocation2 + $0x40] sm:$0xf]  ;;  %v1871_v43 = vrot.slane %v867_v29, 9  ;;  %2030 = vmatprep.subr.bf16.mxu1 %v2193_v2 }
  0xa6   : > { %v784_v35 = vsel %vm2646_vm13, %v779_v28, %v783_v0  ;;  %991 = vst.msk [vmem:[#allocation3 + $0x4c] sm:$0xf] %vm424_vm6, %v2757_v31  ;;  %v2194_v45 = vld [vmem:[#allocation7 + $0x18] sm:$0xff]   ;;  %v937_v46 = vrot.slane %v868_v32, 5  ;;  %v940_v47 = vrot.slane %v869_v33, 5  ;;  %946 = vrot.lane.b32.xlu0 %v2708_v53, %s2385_s11  ;;  %v2195_v50 = vld [vmem:[#allocation7 + $0xa8] sm:$0xff]  }
  0xa7   : > { %809 = vst.msk [vmem:[#allocation3 + $0x80] sm:$0xf] %vm424_vm6, %v784_v35  ;;  %v794_v36 = vsel %vm2646_vm13, %v789_v30, %v793_v26  ;;  %1995 = vmatpush3.bf16.msra.mxu0 %v2194_v45  ;;  %753 = vrot.lane.b32.xlu1 %v738_v54, %s2385_s11  ;;  %v812_v52 = vshrl.u32 %v637_v37, 16  ;;  %v815_v55 = vshll.u32 %v637_v37, 16  ;;  %v821_v56 = vshll.u32 %v638_v39, 16  ;;  %v2196_v63 = vld [vmem:[#allocation7 + $0x50] sm:$0xff]  }
  0xa8   : > { %810 = vst.msk [vmem:[#allocation3 + $0x94] sm:$0xf] %vm424_vm6, %v794_v36  ;;  %v2771_v48 = vsel %vm2652_vm14, %v1871_v43, %v937_v46  ;;  %v939_v49 = vrot.slane %v937_v46, 4  ;;  %v825_v59 = vshrl.u32 %v638_v39, 16  ;;  %2031 = vmatpush3.bf16.msra.mxu1 %v2195_v50  ;;  %v2197_v3 = vld [vmem:[#allocation7 + $0xe0] sm:$0xff]   ;;  %1996 = vmatprep.subr.bf16.mxu0 %v2196_v63  ;;  %v2198_v9 = vld [vmem:[#allocation7 + $0x10] sm:$0xff]  }
  0xa9   : > { %992 = vst.msk [vmem:[#allocation3 + $0x60] sm:$0xf] %vm424_vm6, %v2771_v48  ;;  %v814_v60 = vrot.slane %v812_v52, 4  ;;  %v817_v61 = vrot.slane %v815_v55, 5  ;;  %v823_v62 = vrot.slane %v821_v56, 5  ;;  %2032 = vmatprep.subr.bf16.mxu1 %v2197_v3  ;;  %v2199_v12 = vld [vmem:[#allocation7 + $0xa0] sm:$0xff]  }
  0xaa   : > { %v2780_v58 = vsel %vm2652_vm14, %v939_v49, %v940_v47  ;;  %589 = vrot.lane.b32.xlu0 %v2690_v40, %s2385_s11  ;;  %v827_v1 = vrot.slane %v825_v59, 4  ;;  %v639_v5 = vld [vmem:[#allocation2 + $0x44] sm:$0x1]  ;;  %v553_v6 = vld [vmem:[#allocation2] sm:$0xf]  ;;  %v2200_v54 = vld [vmem:[#allocation7 + $0x48] sm:$0xff]  }
  0xab   : > { %993 = vst.msk [vmem:[#allocation3 + $0x74] sm:$0xf] %vm424_vm6, %v2780_v58  ;;  %948 = vrot.lane.b32.xlu1 %v2728_v10, %s2385_s11  ;;  %v818_v7 = vor.u32 %v817_v61, %v814_v60  ;;  %565 = vst.msk [vmem:[#allocation3] sm:$0xf] %vm424_vm6, %v553_v6  ;;  %v554_v40 = vld [vmem:[#allocation2 + $0x4] sm:$0xf]  ;;  %1997 = vmatpush3.bf16.msra.mxu0 %v2198_v9 }
  0xac   : > { %v831_v8 = vshll.u32 %v639_v5, 16  ;;  %566 = vst.msk [vmem:[#allocation3 + $0x14] sm:$0xf] %vm424_vm6, %v554_v40  ;;  %v828_v13 = vor.u32 %v827_v1, %v823_v62  ;;  %2033 = vmatpush3.bf16.msra.mxu1 %v2199_v12  ;;  %1998 = vmatprep.subr.bf16.mxu0 %v2200_v54  ;;  %v2202_v15 = vld [vmem:[#allocation7 + $0x8] sm:$0xff]   ;;  %v2203_v38 = vld [vmem:[#allocation7 + $0x98] sm:$0xff]   ;;  %v2204_v0 = vld [vmem:[#allocation7 + $0x40] sm:$0xff]  }
  0xad   : > { %v819_v11 = vrot.slane %v818_v7, 4  ;;  %v2205_v18 = vld [vmem:[#allocation7 + $0xd0] sm:$0xff]   ;;  %v2211_v22 = vld [vmem:[#allocation7 + $0xc8] sm:$0xff]   ;;  %v2213_v25 = vld [vmem:[#allocation7 + $0xc0] sm:$0xff]   ;;  %vm605_vm15 = vcmask 1043968   ;;  %vm1408_vm0 = vcmask 523264  }
  0xae   : > { %835 = vrot.lane.b32.xlu0 %v784_v35, %s2385_s11  ;;  %v833_v17 = vrot.slane %v831_v8, 5  ;;  %v829_v41 = vrot.slane %v828_v13, 4  ;;  %v2207_v19 = vld [vmem:[#allocation7 + $0x90] sm:$0xff]   ;;  %v2212_v23 = vld [vmem:[#allocation7 + $0x88] sm:$0xff]   ;;  %v2214_v26 = vld [vmem:[#allocation7 + $0x80] sm:$0xff]   ;;  %s1962_s22 = sshll.u32 %s2369_s18, 9 }
  0xaf   : > { %591 = vrot.lane.b32.xlu1 %v2710_v57, %s2385_s11  ;;  %v2201_v57 = vld [vmem:[#allocation7 + $0xd8] sm:$0xff]   ;;  %v824_v16 = vsel %vm2646_vm13, %v819_v11, %v823_v62  ;;  %1999 = vmatpush3.bf16.msra.mxu0 %v2202_v15  ;;  %v870_v28 = vld [vmem:[#allocation2 + $0x3c] sm:$0xe]  ;;  %v857_v46 = vld [vmem:[#allocation2 + $0x8] sm:$0x1]  ;;  %s1712_s24 = sshll.u32 %s2606_s7, 4  ;;  %s2889_s30 = scalar_lea.hbm %s2948_s4, %s1962_s22  ;;  %s2892_s24 = int_to_ptr.vmem [resolvable:$true] %s1712_s24 }
  0xb0   : > { %2034 = vmatprep.subr.bf16.mxu1 %v2201_v57  ;;  %2000 = vmatprep.subr.bf16.mxu0 %v2204_v0  ;;  %v834_v20 = vsel %vm2646_vm13, %v829_v41, %v833_v17  ;;  %v2810_v27 = vld [vmem:[#allocation7 + $0x118] sm:$0xff]   ;;  %v1872_v32 = vrot.slane %v870_v28, 9  ;;  %v893_v49 = vrot.slane %v857_v46, 5  ;;  %v2226_v3 = vld [vmem:[#allocation7 + $0x110] sm:$0xff]   ;;  %v2229_v7 = vld [vmem:[#allocation7 + $0x108] sm:$0xff]   ;;  %s2897_s6 = scalar_lea.sflag [#allocation6], %s277_s26 }
  0xb1   : > { %2035 = vmatpush3.bf16.msra.mxu1 %v2203_v38  ;;  %v564_v42 = vld [vmem:[#allocation2 + $0x40] sm:$0xf]  ;;  %v872_v30 = vld [vmem:[#allocation2 + $0x44] sm:$0x1]  ;;  %v2233_v11 = vld [vmem:[#allocation7 + $0x100] sm:$0xff]   ;;  %s2293_s18 = scalar_lea.vmem %s2892_s24, 512 }
  0xb2   : > { %950 = vrot.lane.b32.xlu0 %v2749_v24, %s2385_s11  ;;  %2036 = vmatprep.subr.bf16.mxu1 %v2205_v18  ;;  %621 = vst.msk [vmem:[#allocation3 + $0x98] sm:$0xf] %vm424_vm6, %v564_v42  ;;  %v871_v29 = vld [vmem:[#allocation2 + $0x40] sm:$0xf]  ;;  %v982_v34 = vrot.slane %v872_v30, 5  ;;  %p2294_p13 = scmp.ne.s32.totalorder %s2892_s24, %s2293_s18  ;;  %p2967_p0 = scmp.ne.s32.totalorder %s2950_s25, 0 }
  0xb3   : > { %837 = vrot.lane.b32.xlu1 %v794_v36, %s2385_s11  ;;  %v979_v33 = vrot.slane %v871_v29, 5  ;;  %v855_v37 = vld [vmem:[#allocation2] sm:$0xe]  ;;  %v856_v39 = vld [vmem:[#allocation2 + $0x4] sm:$0xf]  ;;  %s2386_s8 = smov [#allocation9]  }
  0xb4   : > { %v1867_v43 = vrot.slane %v855_v37, 9  ;;  %v890_v45 = vrot.slane %v856_v39, 5  ;;  %p2295_p6 = pnand %p2294_p13, %p2967_p0  ;;  %s2297_s9 = sshll.u32 %s2386_s8, 4  ;;  %s2298_s9 = int_to_ptr.vmem [resolvable:$false] %s2297_s9 }
  0xb5   : > { %2037 = vmatpush3.bf16.msra.mxu1 %v2207_v19  ;;  %v980_v35 = vsel %vm2652_vm14, %v1872_v32, %v979_v33  ;;  %v981_v2 = vrot.slane %v979_v33, 4  ;;  %v2237_v33 = vld [vmem:[#allocation3 + $0x10] ss:$20 sps:$4 sm:$0xff]   ;;  %s2299_s10 = scalar_lea.vmem %s2298_s9, 1024  ;;  %p2300_p9 = scmp.lt.s32.totalorder %s2892_s24, %s2298_s9 }
  0xb6   : > { %593 = vrot.lane.b32.xlu0 %v2730_v14, %s2385_s11  ;;  %v2206_v14 = vld [vmem:[#allocation7] sm:$0xff]   ;;  %2038 = vmatprep.subr.bf16.mxu1 %v2211_v22  ;;  %994 = vst.msk [vmem:[#allocation3 + $0x88] sm:$0xf] %vm424_vm6, %v980_v35  ;;  %v891_v47 = vsel %vm2652_vm14, %v1867_v43, %v890_v45  ;;  %p2296_p7 = pneg %p2295_p6  ;;  %p2301_p12 = scmp.lt.s32.totalorder %s2299_s10, %s2293_s18 }
  0xb7   : > { %952 = vrot.lane.b32.xlu1 %v2757_v31, %s2385_s11  ;;  %2001 = vmatpush3.bf16.msra.mxu0 %v2206_v14  ;;  %v983_v36 = vsel %vm2652_vm14, %v981_v2, %v982_v34  ;;  %v2239_v2 = vld [vmem:[#allocation3 + $0x60] ss:$20 sps:$4 sm:$0xff]  }
  0xb8   : > { %2074 = vmatprep.subr.bf16.mxu0 %v2810_v27  ;;  %995 = vst.msk [vmem:[#allocation3 + $0x9c] sm:$0xf] %vm424_vm6, %v983_v36  ;;  %p2302_p1 = por %p2301_p12, %p2300_p9 }
  0xb9   : > { %2039 = vmatpush3.bf16.msra.mxu1 %v2212_v23 }
  0xba   : > { %839 = vrot.lane.b32.xlu0 %v824_v16, %s2385_s11  ;;  %2040 = vmatprep.subr.bf16.mxu1 %v2213_v25  ;;  %p2303_p2 = pnand %p2302_p1, %p2296_p7 }
  0xbb   : > { %595 = vrot.lane.b32.xlu1 %v2742_v21, %s2385_s11  ;;  %v563_v21 = vld [vmem:[#allocation2 + $0x3c] sm:$0xf] }
  0xbc   : > { %620 = vst.msk [vmem:[#allocation3 + $0x84] sm:$0xf] %vm424_vm6, %v563_v21 }
  0xbd   : > { %2041 = vmatpush3.bf16.msra.mxu1 %v2214_v26 }
  0xbe   : > { %954 = vrot.lane.b32.xlu0 %v2771_v48, %s2385_s11  ;;  %2090 = vmatprep.subr.bf16.mxu1 %v2810_v27  ;;  %v892_v48 = vrot.slane %v890_v45, 4 }
  0xbf   : > { %841 = vrot.lane.b32.xlu1 %v834_v20, %s2385_s11  ;;  %v2240_v39 = vld [vmem:[#allocation3 + $0x88] ss:$20 sps:$4 sm:$0xff]  }
  0xc0   : > { %v894_v52 = vsel %vm2652_vm14, %v892_v48, %v893_v49 }
  0xc3   : > { %956 = vrot.lane.b32.xlu1 %v2780_v58, %s2385_s11 }
  0xf6   : > { %v582_v50 = vpop.permute.xlu0 %581 }
  0xf7   : > { %606 = vst.msk [vmem:[#allocation3 + $0x4] sm:$0xf] %vm605_vm15, %v582_v50 }
  0xf8   : > { %924 = vst.msk [vmem:[#allocation3 + $0x4] sm:$0xf] %vm424_vm6, %v891_v47 }
  0xfa   : > { %v584_v55 = vpop.permute.xlu0 %583 }
  0xfb   : > { %607 = vst.msk [vmem:[#allocation3 + $0x18] sm:$0xf] %vm605_vm15, %v584_v55 }
  0xfc   : > { %925 = vst.msk [vmem:[#allocation3 + $0x18] sm:$0xf] %vm424_vm6, %v894_v52 }
 0x101   : > { %v740_v56 = vpop.permute.xlu1 %739 }
 0x102   : > { %763 = vst.msk [vmem:[#allocation3] sm:$0xf] %vm605_vm15, %v740_v56 }
 0x103   : > { %v2210_v1 = vld [vmem:[#allocation3 + $0x4] ss:$20 sps:$4 sm:$0xff]  }
 0x104   : > { %v748_v58 = vpop.permute.xlu0 %747  ;;  %1453 = vmatprep.mubr.bf16.mxu0 %v2210_v1 }
 0x105   : > { %767 = vst.msk [vmem:[#allocation3 + $0x50] sm:$0xf] %vm605_vm15, %v748_v58  ;;  %847 = vst.msk [vmem:[#allocation3 + $0xc] sm:$0xf] %vm605_vm15, %v748_v58  ;;  %v742_v59 = vpop.permute.xlu1 %741 }
 0x106   : > { %764 = vst.msk [vmem:[#allocation3 + $0x14] sm:$0xf] %vm605_vm15, %v742_v59 }
 0x108   : > { %v943_v60 = vpop.permute.xlu0 %942 }
 0x109   : > { %966 = vst.msk [vmem:[#allocation3 + $0x8] sm:$0xf] %vm605_vm15, %v943_v60  ;;  %v750_v51 = vpop.permute.xlu1 %749 }
 0x10a   : > { %768 = vst.msk [vmem:[#allocation3 + $0x64] sm:$0xf] %vm605_vm15, %v750_v51  ;;  %848 = vst.msk [vmem:[#allocation3 + $0x20] sm:$0xf] %vm605_vm15, %v750_v51 }
 0x10c   : > { %v586_v61 = vpop.permute.xlu0 %585 }
 0x10d   : > { %608 = vst.msk [vmem:[#allocation3 + $0x2c] sm:$0xf] %vm605_vm15, %v586_v61  ;;  %v945_v62 = vpop.permute.xlu1 %944  ;;  %v2208_v63 = vld [vmem:[#allocation3] ss:$20 sps:$4 sm:$0xff]  }
 0x10e   : > { %926 = vst.msk [vmem:[#allocation3 + $0x2c] sm:$0xf] %vm424_vm6, %v2674_v4  ;;  %1454 = vmatmul.mubr.bf16.vlgmr.msra.gmra.mxu0 %v2208_v63 }
 0x10f   : > { %967 = vst.msk [vmem:[#allocation3 + $0x1c] sm:$0xf] %vm605_vm15, %v945_v62  ;;  %2075 = vmatpush3.bf16.msra.mxu0 %v2810_v27 }
 0x110   : > { %v744_v5 = vpop.permute.xlu0 %743  ;;  %2076 = vmatprep.subr.bf16.mxu0 %v2226_v3 }
 0x111   : > { %765 = vst.msk [vmem:[#allocation3 + $0x28] sm:$0xf] %vm605_vm15, %v744_v5  ;;  %v588_v6 = vpop.permute.xlu1 %587  ;;  %v2217_v9 = vld [vmem:[#allocation3 + $0xc] ss:$20 sps:$4 sm:$0xff]   ;;  %v2225_v25 = vld [vmem:[#allocation3 + $0x50] ss:$20 sps:$4 sm:$0xff]  }
 0x112   : > { %609 = vst.msk [vmem:[#allocation3 + $0x40] sm:$0xf] %vm605_vm15, %v588_v6  ;;  %1518 = vmatprep.mubr.bf16.mxu1 %v2217_v9 }
 0x113   : > { %927 = vst.msk [vmem:[#allocation3 + $0x40] sm:$0xf] %vm424_vm6, %v2697_v44  ;;  %2077 = vmatpush3.bf16.msra.mxu0 %v2226_v3 }
 0x114   : > { %v752_v40 = vpop.permute.xlu0 %751  ;;  %2078 = vmatprep.subr.bf16.mxu0 %v2229_v7 }
 0x115   : > { %769 = vst.msk [vmem:[#allocation3 + $0x78] sm:$0xf] %vm605_vm15, %v752_v40  ;;  %849 = vst.msk [vmem:[#allocation3 + $0x34] sm:$0xf] %vm605_vm15, %v752_v40  ;;  %v746_v4 = vpop.permute.xlu1 %745 }
 0x116   : > { %v2215_v8 = vld [vmem:[#allocation3 + $0x8] ss:$20 sps:$4 sm:$0xff]   ;;  %766 = vst.msk [vmem:[#allocation3 + $0x3c] sm:$0xf] %vm605_vm15, %v746_v4 }
 0x117   : > { %1519 = vmatmul.mubr.bf16.vlgmr.msra.gmra.mxu1 %v2215_v8  ;;  %2079 = vmatpush3.bf16.msra.mxu0 %v2229_v7 }
 0x118   : > { %v947_v12 = vpop.permute.xlu0 %946  ;;  %2094 = vmatpush3.bf16.msra.mxu1 %v2810_v27  ;;  %2080 = vmatprep.subr.bf16.mxu0 %v2233_v11  ;;  %v1002_v44 = vld [vmem:[#allocation3 + $0x28] sm:$0xff] }
 0x119   : > { %968 = vst.msk [vmem:[#allocation3 + $0x30] sm:$0xf] %vm605_vm15, %v947_v12  ;;  %v754_v13 = vpop.permute.xlu1 %753  ;;  %2091 = vmatprep.subr.bf16.mxu1 %v2226_v3 }
 0x11a   : > { %770 = vst.msk [vmem:[#allocation3 + $0x8c] sm:$0xf] %vm605_vm15, %v754_v13  ;;  %850 = vst.msk [vmem:[#allocation3 + $0x48] sm:$0xf] %vm605_vm15, %v754_v13  ;;  %v2218_v16 = vld [vmem:[#allocation3 + $0x2c] ss:$20 sps:$4 sm:$0xff]  }
 0x11b   : > { %2081 = vmatpush3.bf16.msra.mxu0 %v2233_v11  ;;  %1461 = vmatprep.mubr.bf16.mxu0 %v2218_v16 }
 0x11c   : > { %v590_v54 = vpop.permute.xlu0 %589  ;;  %2095 = vmatpush3.bf16.msra.mxu1 %v2226_v3 }
 0x11d   : > { %610 = vst.msk [vmem:[#allocation3 + $0x54] sm:$0xf] %vm605_vm15, %v590_v54  ;;  %v949_v57 = vpop.permute.xlu1 %948  ;;  %v1005_v15 = vld [vmem:[#allocation3 + $0x3c] sm:$0xff]  ;;  %2092 = vmatprep.subr.bf16.mxu1 %v2229_v7 }
 0x11e   : > { %928 = vst.msk [vmem:[#allocation3 + $0x54] sm:$0xf] %vm424_vm6, %v2708_v53  ;;  %v1878_v17 = vcombine.low %v1002_v44, %v1005_v15 }
 0x11f   : > { %969 = vst.msk [vmem:[#allocation3 + $0x44] sm:$0xf] %vm605_vm15, %v949_v57 }
 0x120   : > { %v836_v38 = vpop.permute.xlu0 %835  ;;  %1462 = vmatmul.mubr.bf16.gmra.mxu0 %v1878_v17  ;;  %2096 = vmatpush3.bf16.msra.mxu1 %v2229_v7  ;;  %v1003_v18 = vld [vmem:[#allocation3 + $0x30] sm:$0xff] }
 0x121   : > { %851 = vst.msk [vmem:[#allocation3 + $0x5c] sm:$0xf] %vm605_vm15, %v836_v38  ;;  %v592_v41 = vpop.permute.xlu1 %591  ;;  %2093 = vmatprep.subr.bf16.mxu1 %v2233_v11  ;;  %v2220_v19 = vld [vmem:[#allocation3 + $0x34] ss:$20 sps:$4 sm:$0xff]   ;;  %v2232_v35 = vld [vmem:[#allocation3 + $0x78] ss:$20 sps:$4 sm:$0xff]  }
 0x122   : > { %611 = vst.msk [vmem:[#allocation3 + $0x68] sm:$0xf] %vm605_vm15, %v592_v41  ;;  %1526 = vmatprep.mubr.bf16.mxu1 %v2220_v19  ;;  %v1933_v41 = vld [vmem:[%s2946_s2] ss:$0 sm:$0xff] }
 0x123   : > { %929 = vst.msk [vmem:[#allocation3 + $0x68] sm:$0xf] %vm424_vm6, %v2728_v10 }
 0x124   : > { %v951_v0 = vpop.permute.xlu0 %950  ;;  %2097 = vmatpush3.bf16.msra.mxu1 %v2233_v11 }
 0x125   : > { %970 = vst.msk [vmem:[#allocation3 + $0x58] sm:$0xf] %vm605_vm15, %v951_v0  ;;  %v838_v53 = vpop.permute.xlu1 %837 }
 0x126   : > { %v1006_v14 = vld [vmem:[#allocation3 + $0x44] sm:$0xff]  ;;  %852 = vst.msk [vmem:[#allocation3 + $0x70] sm:$0xf] %vm605_vm15, %v838_v53 }
 0x127   : > { %v1880_v20 = vcombine.low %v1003_v18, %v1006_v14 }
 0x128   : > { %v594_v22 = vpop.permute.xlu0 %593 }
 0x129   : > { %1527 = vmatmul.mubr.bf16.gmra.mxu1 %v1880_v20  ;;  %612 = vst.msk [vmem:[#allocation3 + $0x7c] sm:$0xf] %vm605_vm15, %v594_v22  ;;  %v953_v23 = vpop.permute.xlu1 %952 }
 0x12a   : > { %930 = vst.msk [vmem:[#allocation3 + $0x7c] sm:$0xf] %vm424_vm6, %v2749_v24  ;;  %v2223_v10 = vld [vmem:[#allocation3 + $0x54] ss:$20 sps:$4 sm:$0xff]  }
 0x12b   : > { %971 = vst.msk [vmem:[#allocation3 + $0x6c] sm:$0xf] %vm605_vm15, %v953_v23  ;;  %1469 = vmatprep.mubr.bf16.mxu0 %v2223_v10 }
 0x12c   : > { %v840_v26 = vpop.permute.xlu0 %839  ;;  %1470 = vmatmul.mubr.bf16.gmra.mxu0 %v2225_v25  ;;  %v1009_v42 = vld [vmem:[#allocation3 + $0x58] sm:$0xff] }
 0x12d   : > { %v596_v27 = vpop.permute.xlu1 %595  ;;  %853 = vst.msk [vmem:[#allocation3 + $0x84] sm:$0xf] %vm605_vm15, %v840_v26  ;;  %v2227_v29 = vld [vmem:[#allocation3 + $0x5c] ss:$20 sps:$4 sm:$0xff]  }
 0x12e   : > { %613 = vst.msk [vmem:[#allocation3 + $0x90] sm:$0xf] %vm605_vm15, %v596_v27  ;;  %1534 = vmatprep.mubr.bf16.mxu1 %v2227_v29 }
 0x12f   : > { %931 = vst.msk [vmem:[#allocation3 + $0x90] sm:$0xf] %vm424_vm6, %v2757_v31  ;;  %v2238_v31 = vld [vmem:[#allocation3 + $0x38] ss:$20 sps:$4 sm:$0xff]  }
 0x130   : > { %v955_v21 = vpop.permute.xlu0 %954 }
 0x131   : > { %v842_v28 = vpop.permute.xlu1 %841  ;;  %972 = vst.msk [vmem:[#allocation3 + $0x80] sm:$0xf] %vm605_vm15, %v955_v21 }
 0x132   : > { %v1012_v24 = vld [vmem:[#allocation3 + $0x6c] sm:$0xff]  ;;  %854 = vst.msk [vmem:[#allocation3 + $0x98] sm:$0xf] %vm605_vm15, %v842_v28  ;;  %v1934_v28 = vld [vmem:[%s2947_s3] ss:$0 sm:$0xff] }
 0x133   : > { %v1885_v30 = vcombine.low %v1009_v42, %v1012_v24 }
 0x135   : > { %1535 = vmatmul.mubr.bf16.gmra.mxu1 %v1885_v30  ;;  %v957_v32 = vpop.permute.xlu1 %956 }
 0x136   : > { %973 = vst.msk [vmem:[#allocation3 + $0x94] sm:$0xf] %vm605_vm15, %v957_v32  ;;  %v2230_v34 = vld [vmem:[#allocation3 + $0x7c] ss:$20 sps:$4 sm:$0xff]  }
 0x137   : > { %1477 = vmatprep.mubr.bf16.mxu0 %v2230_v34 }
 0x138   : > { %1478 = vmatmul.mubr.bf16.gmra.mxu0 %v2232_v35 }
 0x139   : > { %2082 = vmatprep.mubr.msk.bf16.mxu0 %vm1408_vm0, %v2237_v33  ;;  %v2234_v36 = vld [vmem:[#allocation3 + $0x84] ss:$20 sps:$4 sm:$0xff]  }
 0x13a   : > { %1542 = vmatprep.mubr.bf16.mxu1 %v2234_v36 }
 0x13d   : > { %v2236_v37 = vld [vmem:[#allocation3 + $0x80] ss:$20 sps:$4 sm:$0xff]  }
 0x13e   : > { %1543 = vmatmul.mubr.bf16.gmra.mxu1 %v2236_v37 }
 0x13f   : > { %2086 = vmatprep.mubr.msk.bf16.mxu1 %vm1408_vm0, %v2239_v2 }
 0x140   : > { %2083 = vmatmul.mubr.msk.bf16.vlgmr.msra.gmra.mxu0 %vm1408_vm0, %v2238_v31 }
 0x146   : > { %2087 = vmatmul.mubr.msk.bf16.vlgmr.msra.gmra.mxu1 %vm1408_vm0, %v2240_v39 }
 0x1ce   : > { %v2002_v43 = vpop.f32.mrf.mxu0 }
 0x1d0   : > { %v2003_v45 = vpop.f32.mrf.mxu0 }
 0x1d1   : > { %v2004_v57 = vadd.f32 %v2003_v45, %v2002_v43 }
 0x1d2   : > { %v2005_v46 = vpop.f32.mrf.mxu0 }
 0x1d4   : > { %v2006_v48 = vpop.f32.mrf.mxu0 }
 0x1d5   : > { %v2007_v23 = vadd.f32 %v2006_v48, %v2005_v46 }
 0x1d7   : > { %v2042_v47 = vpop.f32.mrf.mxu1 }
 0x1d9   : > { %v2043_v49 = vpop.f32.mrf.mxu1 }
 0x1da   : > { %v2044_v12 = vadd.f32 %v2043_v49, %v2042_v47 }
 0x1db   : > { %v2045_v52 = vpop.f32.mrf.mxu1 }
 0x1dc   : > { %v1521_v19 = vadd.f32 %v2044_v12, %v2004_v57 }
 0x1dd   : > { %v2046_v56 = vpop.f32.mrf.mxu1 }
 0x1de   : > { %v2047_v0 = vadd.f32 %v2046_v56, %v2045_v52 }
 0x1e0   : > { %v2008_v50 = vpop.f32.mrf.mxu0  ;;  %v1524_v33 = vadd.f32 %v2047_v0, %v2007_v23 }
 0x1e2   : > { %v2009_v55 = vpop.f32.mrf.mxu0 }
 0x1e3   : > { %v2010_v13 = vadd.f32 %v2009_v55, %v2008_v50 }
 0x1e4   : > { %v2011_v58 = vpop.f32.mrf.mxu0 }
 0x1e6   : > { %v2012_v51 = vpop.f32.mrf.mxu0 }
 0x1e7   : > { %v2013_v18 = vadd.f32 %v2012_v51, %v2011_v58 }
 0x1e9   : > { %v2048_v59 = vpop.f32.mrf.mxu1 }
 0x1eb   : > { %v2049_v60 = vpop.f32.mrf.mxu1 }
 0x1ec   : > { %v2014_v61 = vpop.f32.mrf.mxu0  ;;  %v2050_v9 = vadd.f32 %v2049_v60, %v2048_v59 }
 0x1ed   : > { %v2051_v62 = vpop.f32.mrf.mxu1 }
 0x1ee   : > { %v2015_v63 = vpop.f32.mrf.mxu0  ;;  %v1529_v17 = vadd.f32 %v2050_v9, %v2010_v13 }
 0x1ef   : > { %v2052_v1 = vpop.f32.mrf.mxu1  ;;  %v2016_v34 = vadd.f32 %v2015_v63, %v2014_v61 }
 0x1f0   : > { %v2017_v3 = vpop.f32.mrf.mxu0  ;;  %v2053_v15 = vadd.f32 %v2052_v1, %v2051_v62 }
 0x1f2   : > { %v2018_v7 = vpop.f32.mrf.mxu0  ;;  %v1532_v27 = vadd.f32 %v2053_v15, %v2013_v18 }
 0x1f3   : > { %v2019_v56 = vadd.f32 %v2018_v7, %v2017_v3 }
 0x1f5   : > { %v2054_v5 = vpop.f32.mrf.mxu1 }
 0x1f7   : > { %v2055_v6 = vpop.f32.mrf.mxu1 }
 0x1f8   : > { %v2020_v40 = vpop.f32.mrf.mxu0  ;;  %v2056_v21 = vadd.f32 %v2055_v6, %v2054_v5 }
 0x1f9   : > { %v2057_v4 = vpop.f32.mrf.mxu1 }
 0x1fa   : > { %v2021_v8 = vpop.f32.mrf.mxu0  ;;  %v1537_v48 = vadd.f32 %v2056_v21, %v2016_v34 }
 0x1fb   : > { %v2058_v44 = vpop.f32.mrf.mxu1  ;;  %v2022_v42 = vadd.f32 %v2021_v8, %v2020_v40 }
 0x1fc   : > { %v2023_v11 = vpop.f32.mrf.mxu0  ;;  %v2059_v45 = vadd.f32 %v2058_v44, %v2057_v4 }
 0x1fe   : > { %v2024_v54 = vpop.f32.mrf.mxu0  ;;  %v2060_v16 = vpop.f32.mrf.mxu1  ;;  %v1540_v6 = vadd.f32 %v2059_v45, %v2019_v56 }
 0x1ff   : > { %v2025_v46 = vadd.f32 %v2024_v54, %v2023_v11 }
 0x200   : > { %v2084_v38 = vpop.f32.mrf.mxu0  ;;  %v2061_v14 = vpop.f32.mrf.mxu1 }
 0x201   : > { %v1594_v53 = vadd.f32 %v2084_v38, %v1529_v17  ;;  %v2062_v20 = vadd.f32 %v2061_v14, %v2060_v16 }
 0x202   : > { %v1585_v22 = vpop.f32.mrf.mxu0  ;;  %v2063_v26 = vpop.f32.mrf.mxu1 }
 0x203   : > { %v1625_v10 = vmul.f32 %v1933_v41, %v1594_v53  ;;  %v1586_v25 = vadd.f32 %v1585_v22, %v1521_v19  ;;  %v1545_v2 = vadd.f32 %v2062_v20, %v2022_v42 }
 0x204   : > { %v2085_v24 = vpop.f32.mrf.mxu0  ;;  %v2064_v32 = vpop.f32.mrf.mxu1 }
 0x205   : > { %v1623_v29 = vmul.f32 %v1933_v41, %v1586_v25  ;;  %v1597_v30 = vadd.f32 %v2085_v24, %v1532_v27  ;;  %v2065_v35 = vadd.f32 %v2064_v32, %v2063_v26  ;;  %v1640_v36 = vadd.f32 %v1934_v28, %v1625_v10 }
 0x206   : > { %v1588_v31 = vpop.f32.mrf.mxu0  ;;  %v2088_v43 = vpop.f32.mrf.mxu1 }
 0x207   : > { %v1626_v37 = vmul.f32 %v1933_v41, %v1597_v30  ;;  %v1589_v39 = vadd.f32 %v1588_v31, %v1524_v33  ;;  %v1610_v47 = vadd.f32 %v2088_v43, %v1545_v2  ;;  %v1638_v49 = vadd.f32 %v1934_v28, %v1623_v29 }
 0x208   : > { %v1601_v55 = vpop.f32.mrf.mxu1  ;;  %v1548_v60 = vadd.f32 %v2065_v35, %v2025_v46  ;;  %v1648_v51 = vmax.f32 %v1640_v36, 0.0 }
 0x209   : > { %v1641_v50 = vadd.f32 %v1934_v28, %v1626_v37  ;;  %v1624_v52 = vmul.f32 %v1933_v41, %v1589_v39  ;;  %v1629_v58 = vmul.f32 %v1933_v41, %v1610_v47  ;;  %v1602_v59 = vadd.f32 %v1601_v55, %v1537_v48 }
 0x20a   : > { %v2089_v63 = vpop.f32.mrf.mxu1  ;;  %v1646_v40 = vmax.f32 %v1638_v49, 0.0 }
 0x20b   : > { %v1649_v61 = vmax.f32 %v1641_v50, 0.0  ;;  %v1639_v62 = vadd.f32 %v1934_v28, %v1624_v52  ;;  %v1627_v1 = vmul.f32 %v1933_v41, %v1602_v59  ;;  %v1613_v5 = vadd.f32 %v2089_v63, %v1548_v60 }
 0x20c   : > { %v1604_v9 = vpop.f32.mrf.mxu1  ;;  %v1644_v11 = vadd.f32 %v1934_v28, %v1629_v58 }
 0x20d   : > { %v1971_v4 = vpack.c.bf16 %v1649_v61, %v1648_v51  ;;  %v1647_v8 = vmax.f32 %v1639_v62, 0.0  ;;  %v1630_v3 = vmul.f32 %v1933_v41, %v1613_v5  ;;  %v1605_v7 = vadd.f32 %v1604_v9, %v1540_v6 }
 0x20e   : > { %v1642_v13 = vadd.f32 %v1934_v28, %v1627_v1  ;;  %v1652_v57 = vmax.f32 %v1644_v11, 0.0 }
 0x20f   : > { %1983 = vst [vmem:[%s2606_s7 + $0x8] sm:$0xff] %v1971_v4   ;;  %v1966_v12 = vpack.c.bf16 %v1647_v8, %v1646_v40  ;;  %v1645_v44 = vadd.f32 %v1934_v28, %v1630_v3  ;;  %v1628_v54 = vmul.f32 %v1933_v41, %v1605_v7 }
 0x210   : > { %v1650_v17 = vmax.f32 %v1642_v13, 0.0 }
 0x211   : > { %1967 = vst [vmem:[%s2606_s7] sm:$0xff] %v1966_v12   ;;  %v1653_v15 = vmax.f32 %v1645_v44, 0.0  ;;  %v1643_v16 = vadd.f32 %v1934_v28, %v1628_v54 }
 0x213   : > { %v1981_v38 = vpack.c.bf16 %v1653_v15, %v1652_v57  ;;  %v1651_v0 = vmax.f32 %v1643_v16, 0.0 }
 0x215   : > { %1985 = vst [vmem:[%s2606_s7 + $0x18] sm:$0xff] %v1981_v38   ;;  %v1976_v18 = vpack.c.bf16 %v1651_v0, %v1650_v17 }
 0x217   : > { %1984 = vst [vmem:[%s2606_s7 + $0x10] sm:$0xff] %v1976_v18  }
 0x218   : > { %2306 = shalt.err (!%p2303_p2)
}
 0x219   : > { %s2307_s26 = scalar_lea.hbm %s2889_s30, 512  ;;  %s2311_s13 = scalar_lea.hbm %s2948_s4, 2048 }
 0x21a   : > { %p2308_p5 = scmp.ne.s32.totalorder %s2889_s30, %s2307_s26  ;;  %p2312_p8 = scmp.lt.s32.totalorder %s2889_s30, %s2948_s4 }
 0x21b   : > { %p2313_p10 = scmp.lt.s32.totalorder %s2311_s13, %s2307_s26 }
 0x21c   : > { %p2309_p3 = pnand %p2308_p5, %p2967_p0 }
 0x21d   : > { %p2314_p11 = por %p2313_p10, %p2312_p8 }
 0x21e   : > { %p2310_p4 = pneg %p2309_p3 }
 0x220   : > { %p2315_p13 = pnand %p2314_p11, %p2310_p4 }
 0x222   : > { %2318 = shalt.err (!%p2315_p13)
}
 0x223   : > { %s2387_s22 = smov 4  }
 0x224   : > { %2106 = dma.vmem_to_hbm [thread:$0]  (%p2967_p0), %s2892_s24, 512, %s2889_s30, %s2897_s6, %s2385_s11, %s2385_s11, %s2387_s22  }
 0x225 PF: > { %p2123_p6 = scmp.ge.s32.totalorder %s2377_s20, 2  ;;  %s1727_s29 = sand.u32 1, %s2357_s15  }
 0x226   : > { %p2968_p7 = scmp.ne.s32.totalorder %s2951_s27, 0  ;;  %s1728_s5 = scalar_lea.sflag [#allocation6], %s1727_s29 }
 0x228   : > { %p2116_p9 = pnand %p2123_p6, %p2968_p7 }
 0x22a   : > { %p2117_p12 = pneg %p2116_p9 }
 0x22c   : > { %2352 = dma.done.wait (%p2117_p12), %s1728_s5, 512  }
 0x22d   : > { %2354 = vsyncadd (%p2117_p12), %s1728_s5, 4294966784  ;;  %s19_s20 = sadd.s32 1, %s2377_s20   ;;  %s2969_s15 = smov %s2361_s16 }
 0x22e   : > { %p16_p1 = scmp.ge.s32.totalorder %s19_s20, 6   ;;  %s2970_s16 = smov %s2365_s17 }
 0x22f   : > { %s2971_s17 = smov %s2466_s28  ;;  %s2972_s18 = smov %s2373_s19 }
 0x230   : > { %s2973_s19 = smov %s2975_s23  ;;  %18 = sbr.rel (!%p16_p1) target bundleno = 6 (0x6), region = 107 }
 0x235   :  { %1733 = vsyncpa [#allocation5], 1 }
 0x236   :  { %1735 = vsyncpa [#allocation5 + $0x1], 1 }
 0x237   :  { %1736 = vsyncpa [#allocation8], 1 }
 0x238   :  { %1737 = vsyncpa [#allocation6], 1 }
 0x239   :  { %1739 = vsyncpa [#allocation6 + $0x1], 1 }

</bundles_post_ra>
